<compile_context>
chip_gen: v5e
topology: v5e:2x2
jax: 0.10.0
libtpu: 0.0.40
codegen_flags: <defaults>
</compile_context>

<pallas_src>
import math

import jax
import jax.numpy as jnp
from jax.experimental import pallas as pl
from jax.experimental.pallas import tpu as pltpu


K = 4          # kernel_size == stride for both transposed convs
BN_EPS = 1e-3


# ----------------------------------------------------------------------------
# Fused Pallas kernel: both decoder layers in one pass
#   h = hardswish(x @ w1 + t1) ; y = relu(h @ w2 + t2)
# ----------------------------------------------------------------------------
def _decoder_kernel(x_ref, w1_ref, t1_ref, w2_ref, t2_ref, o_ref):
    # layer 1: ConvTranspose(672->16, k=s=4) + BN + Hardswish, as a matmul
    h = jnp.dot(x_ref[...], w1_ref[...], preferred_element_type=jnp.float32)
    h = h + t1_ref[...]
    h = h * jnp.clip(h + 3.0, 0.0, 6.0) * (1.0 / 6.0)          # hardswish
    # layer 2: ConvTranspose(16->3, k=s=4) + BN + ReLU, as a block-diagonal matmul
    y = jnp.dot(h.astype(w2_ref.dtype), w2_ref[...],
                preferred_element_type=jnp.float32)
    y = y + t2_ref[...]
    o_ref[...] = jnp.maximum(y, 0.0).astype(o_ref.dtype)


def _pick_block_m(m, cap=512):
    """Largest row tile <= cap that divides m; m itself when the problem is small."""
    if m <= cap:
        return m
    for bm in range(cap - cap % 16, 15, -16):
        if m % bm == 0:
            return bm
    return m


def _fused_decoder_matmuls(x2d, w1, t1, w2, t2):
    m, k1 = x2d.shape
    n1 = w1.shape[1]
    n2 = w2.shape[1]
    bm = _pick_block_m(m)
    grid = (m // bm,)
    return pl.pallas_call(
        _decoder_kernel,
        out_shape=jax.ShapeDtypeStruct((m, n2), jnp.float32),
        grid=grid,
        in_specs=[
            pl.BlockSpec((bm, k1), lambda i: (i, 0)),   # activations: tiled over rows
            pl.BlockSpec((k1, n1), lambda i: (0, 0)),   # layer-1 weights (resident)
            pl.BlockSpec((1, n1), lambda i: (0, 0)),    # layer-1 shift
            pl.BlockSpec((n1, n2), lambda i: (0, 0)),   # layer-2 block-diag weights
            pl.BlockSpec((1, n2), lambda i: (0, 0)),    # layer-2 shift
        ],
        out_specs=pl.BlockSpec((bm, n2), lambda i: (i, 0)),
        compiler_params=pltpu.CompilerParams(
            # Row tiles are independent: shard across v7x's 2 TensorCores and let
            # BlockSpec double-buffering pipeline them whenever grid > 1.
            dimension_semantics=("parallel",),
        ),
    )(x2d, w1, t1, w2, t2)


# ----------------------------------------------------------------------------
# Parameter folding: conv bias + eval-mode BN -> matmul operands
# ----------------------------------------------------------------------------
def _fold_params(params, compute_dtype=jnp.bfloat16):
    w1, b1, g1, be1, rm1, rv1 = params["layer1"]
    w2, b2, g2, be2, rm2, rv2 = params["layer2"]
    cin, c1 = w1.shape[0], w1.shape[1]
    c2 = w2.shape[1]
    kk = K * K

    s1 = g1 / jnp.sqrt(rv1 + BN_EPS)                  # (16,)
    t1 = (b1 - rm1) * s1 + be1                        # (16,)
    s2 = g2 / jnp.sqrt(rv2 + BN_EPS)                  # (3,)
    t2 = (b2 - rm2) * s2 + be2                        # (3,)

    # layer-1 weight -> (Cin, kk*C1), columns ordered (p1, q1, o1); BN scale folded in.
    w1cols = jnp.transpose(w1, (0, 2, 3, 1)).reshape(cin, kk * c1)
    w1cols = w1cols * jnp.tile(s1, kk)[None, :]
    shift1 = jnp.tile(t1, kk)[None, :].astype(jnp.float32)                  # (1, 256)

    # layer-2 weight -> (C1, C2*kk), columns (o2, p2, q2); BN scale folded in.
    w2cols = w2.reshape(c1, c2 * kk) * jnp.repeat(s2, kk)[None, :]          # (16, 48)
    # Block-diagonal expansion over the kk (p1,q1) groups: layer 2 consumes layer 1's
    # [M, kk*C1] output directly, and the kernel output becomes lane-dense [M, 768].
    w2big = jnp.kron(jnp.eye(kk, dtype=w2cols.dtype), w2cols)               # (256, 768)
    shift2 = jnp.tile(jnp.repeat(t2, kk), kk)[None, :].astype(jnp.float32)  # (1, 768)

    return (w1cols.astype(compute_dtype), shift1,
            w2big.astype(compute_dtype), shift2, c2)


def _scatter_to_nchw(out2d, bsz, hin, win, c2):
    # rows: (b, i, j)   cols: (p1, q1, o2, p2, q2)
    y = out2d.reshape(bsz, hin, win, K, K, c2, K, K)
    y = jnp.transpose(y, (0, 5, 1, 3, 6, 2, 4, 7))    # (b, o2, i, p1, p2, j, q1, q2)
    return y.reshape(bsz, c2, hin * K * K, win * K * K)


# ----------------------------------------------------------------------------
# Decoder('light', 'transpose') forward
# ----------------------------------------------------------------------------
@jax.jit
def decoder_forward(params, x_nchw):
    bsz, cin, hin, win = x_nchw.shape
    w1cols, t1, w2big, t2, c2 = _fold_params(params)

    # NCHW -> (B*H*W, Cin) pixel-major activations (bf16 for the MXU).
    x2d = jnp.transpose(x_nchw, (0, 2, 3, 1)).reshape(bsz * hin * win, cin)
    out2d = _fused_decoder_matmuls(x2d.astype(w1cols.dtype), w1cols, t1, w2big, t2)

    # Single output-side scatter to NCHW (the only XLA layout op after the kernel).
    return _scatter_to_nchw(out2d, bsz, hin, win, c2)


# ----------------------------------------------------------------------------
# References
# ----------------------------------------------------------------------------
def decoder_emulated(params, x_nchw):
    """Exactly the kernel's folded-bf16 math, in plain XLA ops (tight check)."""
    bsz, cin, hin, win = x_nchw.shape
    w1cols, t1, w2big, t2, c2 = _fold_params(params)
    x2d = jnp.transpose(x_nchw, (0, 2, 3, 1)).reshape(bsz * hin * win, cin)
    h = jnp.dot(x2d.astype(w1cols.dtype), w1cols,
                preferred_element_type=jnp.float32) + t1
    h = h * jnp.clip(h + 3.0, 0.0, 6.0) * (1.0 / 6.0)
    y = jnp.dot(h.astype(w2big.dtype), w2big,
                preferred_element_type=jnp.float32) + t2
    y = jnp.maximum(y, 0.0)
    return _scatter_to_nchw(y, bsz, hin, win, c2)


def _ref_block_f32(x_nchw, layer_params, act):
    w, b, g, be, rm, rv = layer_params
    bsz, cin, hin, win = x_nchw.shape
    cout = w.shape[1]
    y = jnp.einsum("nchw,copq->nohpwq", x_nchw, w,
                   precision=jax.lax.Precision.HIGHEST)
    y = y.reshape(bsz, cout, hin * K, win * K) + b[None, :, None, None]
    scale = g / jnp.sqrt(rv + BN_EPS)
    y = (y - rm[None, :, None, None]) * scale[None, :, None, None] \
        + be[None, :, None, None]
    if act == "hardswish":
        return y * jnp.clip(y + 3.0, 0.0, 6.0) / 6.0
    return jnp.maximum(y, 0.0)


def decoder_ref_f32(params, x):
    """Pure-f32 PyTorch-equivalent math (eval-mode BN)."""
    y = _ref_block_f32(x, params["layer1"], "hardswish")
    return _ref_block_f32(y, params["layer2"], "relu")


# ----------------------------------------------------------------------------
# Parameter init (matches PyTorch ConvTranspose2d / BatchNorm2d defaults)
# ----------------------------------------------------------------------------
def init_decoder_params(key):
    def convt_params(key, cin, cout, k):
        kw, kb = jax.random.split(key)
        # PyTorch ConvTranspose2d: fan_in = weight.size(1) * k * k = cout * k * k
        bound = 1.0 / math.sqrt(cout * k * k)
        w = jax.random.uniform(kw, (cin, cout, k, k), jnp.float32, -bound, bound)
        b = jax.random.uniform(kb, (cout,), jnp.float32, -bound, bound)
        gamma = jnp.ones((cout,), jnp.float32)
        beta = jnp.zeros((cout,), jnp.float32)
        running_mean = jnp.zeros((cout,), jnp.float32)
        running_var = jnp.ones((cout,), jnp.float32)
        return (w, b, gamma, beta, running_mean, running_var)

    k1, k2 = jax.random.split(key)
    return {"layer1": convt_params(k1, 672, 16, K),
            "layer2": convt_params(k2, 16, 3, K)}


if __name__ == "__main__":
    key = jax.random.PRNGKey(0)
    kp, kx = jax.random.split(key)
    params = init_decoder_params(kp)

    # Small NCHW input consistent with the module: 672 input channels.
    B, C, H, W = 2, 672, 4, 4
    x = jax.random.normal(kx, (B, C, H, W), jnp.float32)

    out = jax.block_until_ready(decoder_forward(params, x))
    assert out.shape == (B, 3, H * 16, W * 16), out.shape

    # Tight check: identical folded-bf16 math done in plain XLA.
    emul = decoder_emulated(params, x)
    max_d = float(jnp.max(jnp.abs(out - emul)))
    assert max_d < 2e-3, f"kernel vs emulated reference mismatch: {max_d}"

    # Semantic check vs pure-f32 reference (difference = bf16 matmul operands only).
    ref = decoder_ref_f32(params, x)
    rel = float(jnp.linalg.norm(out - ref) / jnp.linalg.norm(ref))
    max_abs = float(jnp.max(jnp.abs(out - ref)))
    assert rel < 3e-2 and max_abs < 5e-2, (rel, max_abs)

    print("KERNEL_OK")
</pallas_src>

<mosaic_0001>
module attributes {stable_mosaic.version = 11 : i64} {
  func.func @_decoder_kernel(%arg0: i32, %arg1: memref<32x672xbf16, #tpu.memory_space<vmem>>, %arg2: memref<672x256xbf16, #tpu.memory_space<vmem>>, %arg3: memref<1x256xf32, #tpu.memory_space<vmem>>, %arg4: memref<256x768xbf16, #tpu.memory_space<vmem>>, %arg5: memref<1x768xf32, #tpu.memory_space<vmem>>, %arg6: memref<32x768xf32, #tpu.memory_space<vmem>>) attributes {dimension_semantics = [#tpu.dimension_semantics<parallel>], iteration_bounds = array<i64: 1>, scalar_prefetch = 0 : i64, scratch_operands = 0 : i64, tpu.core_type = #tpu.core_type<tc>, window_params = [{transform_indices = @transform_0, window_bounds = array<i64: 32, 672>}, {pipeline_mode = #tpu.pipeline_mode<synchronous>, transform_indices = @transform_1, window_bounds = array<i64: 672, 256>}, {pipeline_mode = #tpu.pipeline_mode<synchronous>, transform_indices = @transform_2, window_bounds = array<i64: 1, 256>}, {pipeline_mode = #tpu.pipeline_mode<synchronous>, transform_indices = @transform_3, window_bounds = array<i64: 256, 768>}, {pipeline_mode = #tpu.pipeline_mode<synchronous>, transform_indices = @transform_4, window_bounds = array<i64: 1, 768>}, {transform_indices = @transform_5, window_bounds = array<i64: 32, 768>}]} {
    %c0 = arith.constant 0 : index
    %c0_0 = arith.constant 0 : index
    %0 = vector.load %arg1[%c0, %c0_0] : memref<32x672xbf16, #tpu.memory_space<vmem>>, vector<32x672xbf16>
    %c0_1 = arith.constant 0 : index
    %c0_2 = arith.constant 0 : index
    %1 = vector.load %arg2[%c0_1, %c0_2] : memref<672x256xbf16, #tpu.memory_space<vmem>>, vector<672x256xbf16>
    %cst = arith.constant dense<0.000000e+00> : vector<32x256xf32>
    %2 = tpu.matmul %0, %1, %cst {dimension_numbers = #tpu.dot_dimension_numbers<[1], [0], [0], [1], [0, 0, 1, 1], [], []>} : vector<32x672xbf16>, vector<672x256xbf16>, vector<32x256xf32> -> vector<32x256xf32>
    %c0_3 = arith.constant 0 : index
    %c0_4 = arith.constant 0 : index
    %3 = vector.load %arg3[%c0_3, %c0_4] : memref<1x256xf32, #tpu.memory_space<vmem>>, vector<1x256xf32>
    %4 = vector.broadcast %3 : vector<1x256xf32> to vector<32x256xf32>
    %5 = arith.addf %2, %4 : vector<32x256xf32>
    %cst_5 = arith.constant 3.000000e+00 : f32
    %6 = vector.broadcast %cst_5 : f32 to vector<32x256xf32>
    %7 = arith.addf %5, %6 : vector<32x256xf32>
    %cst_6 = arith.constant 0.000000e+00 : f32
    %cst_7 = arith.constant 6.000000e+00 : f32
    %8 = vector.broadcast %cst_6 : f32 to vector<32x256xf32>
    %9 = arith.maximumf %8, %7 : vector<32x256xf32>
    %10 = vector.broadcast %cst_7 : f32 to vector<32x256xf32>
    %11 = arith.minimumf %10, %9 : vector<32x256xf32>
    %12 = arith.mulf %5, %11 : vector<32x256xf32>
    %cst_8 = arith.constant 0.166666672 : f32
    %13 = vector.broadcast %cst_8 : f32 to vector<32x256xf32>
    %14 = arith.mulf %12, %13 : vector<32x256xf32>
    %15 = arith.truncf %14 : vector<32x256xf32> to vector<32x256xbf16>
    %c0_9 = arith.constant 0 : index
    %c0_10 = arith.constant 0 : index
    %16 = vector.load %arg4[%c0_9, %c0_10] : memref<256x768xbf16, #tpu.memory_space<vmem>>, vector<256x768xbf16>
    %cst_11 = arith.constant dense<0.000000e+00> : vector<32x768xf32>
    %17 = tpu.matmul %15, %16, %cst_11 {dimension_numbers = #tpu.dot_dimension_numbers<[1], [0], [0], [1], [0, 0, 1, 1], [], []>} : vector<32x256xbf16>, vector<256x768xbf16>, vector<32x768xf32> -> vector<32x768xf32>
    %c0_12 = arith.constant 0 : index
    %c0_13 = arith.constant 0 : index
    %18 = vector.load %arg5[%c0_12, %c0_13] : memref<1x768xf32, #tpu.memory_space<vmem>>, vector<1x768xf32>
    %19 = vector.broadcast %18 : vector<1x768xf32> to vector<32x768xf32>
    %20 = arith.addf %17, %19 : vector<32x768xf32>
    %cst_14 = arith.constant 0.000000e+00 : f32
    %21 = vector.broadcast %cst_14 : f32 to vector<32x768xf32>
    %22 = arith.maximumf %20, %21 : vector<32x768xf32>
    %c0_15 = arith.constant 0 : index
    %c0_16 = arith.constant 0 : index
    %23 = vector.load %arg6[%c0_15, %c0_16] : memref<32x768xf32, #tpu.memory_space<vmem>>, vector<32x768xf32>
    tpu.vector_store %arg6[%c0_15, %c0_16], %22 {strides = array<i32>} : memref<32x768xf32, #tpu.memory_space<vmem>>, vector<32x768xf32>,
    return
  }
  func.func @transform_0(%arg0: i32) -> (i32, i32) {
    %c0_i32 = arith.constant 0 : i32
    %c0_i32_0 = arith.constant 0 : i32
    return %arg0, %c0_i32 : i32, i32
  }
  func.func @transform_1(%arg0: i32) -> (i32, i32) {
    %c0_i32 = arith.constant 0 : i32
    %c0_i32_0 = arith.constant 0 : i32
    %c0_i32_1 = arith.constant 0 : i32
    return %c0_i32, %c0_i32_0 : i32, i32
  }
  func.func @transform_2(%arg0: i32) -> (i32, i32) {
    %c0_i32 = arith.constant 0 : i32
    %c0_i32_0 = arith.constant 0 : i32
    %c0_i32_1 = arith.constant 0 : i32
    return %c0_i32, %c0_i32_0 : i32, i32
  }
  func.func @transform_3(%arg0: i32) -> (i32, i32) {
    %c0_i32 = arith.constant 0 : i32
    %c0_i32_0 = arith.constant 0 : i32
    %c0_i32_1 = arith.constant 0 : i32
    return %c0_i32, %c0_i32_0 : i32, i32
  }
  func.func @transform_4(%arg0: i32) -> (i32, i32) {
    %c0_i32 = arith.constant 0 : i32
    %c0_i32_0 = arith.constant 0 : i32
    %c0_i32_1 = arith.constant 0 : i32
    return %c0_i32, %c0_i32_0 : i32, i32
  }
  func.func @transform_5(%arg0: i32) -> (i32, i32) {
    %c0_i32 = arith.constant 0 : i32
    %c0_i32_0 = arith.constant 0 : i32
    return %arg0, %c0_i32 : i32, i32
  }
}

</mosaic_0001>

<bundles_post_ra>
// kernel: tile.25
= control target key start
LH: loop header
LB: loop body
LE: loop exit
PB: predicated region body
PF: predicated region fallthrough
CT: control target
= control target key end

     0   :  { %s30_s8 = smov 16   ;;  %vm7_vm0 = vcmask 130048   ;;  %vm13_vm1 = vcmask 392448   ;;  %vm19_vm2 = vcmask 261248   ;;  %s47_s0 = inlined_call_operand.vmem [shape: f32[3,16], index: 0, kind: input, shape index: {}]   ;;  %s48_s1 = inlined_call_operand.vmem [shape: f32[48], index: 1, kind: output, shape index: {}]  }
   0x1   :  { %v4_v0 = vld [vmem:[%s47_s0] sm:$0xf]  ;;  %s29_s0 = smov 32  }
   0x2   :  { %5 = vst [vmem:[#allocation1] sm:$0xf] %v4_v0 }
   0x9   :  { %v10_v1 = vld [vmem:[#allocation1 + $0x2] sm:$0x1]   ;;  %v16_v2 = vld [vmem:[#allocation1 + $0x1] sm:$0x1]   ;;  %v6_v3 = vld [vmem:[#allocation1] sm:$0x1]  }
   0xa   :  { %11 = vrot.lane.b32.xlu0 %v10_v1, %s29_s0  ;;  %8 = vst.msk [vmem:[#allocation0] sm:$0x1] %vm7_vm0, %v6_v3  }
  0x12   :  { %17 = vrot.lane.b32.xlu0 %v16_v2, %s30_s8 }
  0x7c   :  { %v12_v4 = vpop.permute.xlu0 %11  }
  0x7d   :  { %14 = vst.msk [vmem:[#allocation0] sm:$0x1] %vm13_vm1, %v12_v4  }
  0x84   :  { %v18_v5 = vpop.permute.xlu0 %17  }
  0x85   :  { %20 = vst.msk [vmem:[#allocation0] sm:$0x1] %vm19_vm2, %v18_v5  }
  0x8c   :  { %v23_v6 = vld [vmem:[#allocation0] sm:$0x1] }
  0x8d   :  { %26 = vst [vmem:[%s48_s1] sm:$0x1] %v23_v6 }

// kernel: tile.26
= control target key start
LH: loop header
LB: loop body
LE: loop exit
PB: predicated region body
PF: predicated region fallthrough
CT: control target
= control target key end

     0   :  { %s28_s0 = inlined_call_operand.vmem [shape: f32[48], index: 0, kind: input, shape index: {}]   ;;  %s29_s1 = inlined_call_operand.vmem [shape: f32[16,48], index: 1, kind: output, shape index: {}]  }
   0x1   :  { %v4_v0 = vld [vmem:[%s28_s0] ss:$0 sm:$0xff] }
   0x2   :  { %5 = vst [vmem:[%s29_s1] sm:$0xff] %v4_v0 }
   0x3   :  { %8 = vst [vmem:[%s29_s1 + $0x8] sm:$0xff] %v4_v0 }

// kernel: tile.27
= control target key start
LH: loop header
LB: loop body
LE: loop exit
PB: predicated region body
PF: predicated region fallthrough
CT: control target
= control target key end

     0   :  { %s7_s6 = smov 3  ;;  %s10_s7 = smov 3  ;;  %vm12_vm0 = vcmask 130048   ;;  %vm16_vm1 = vcmask 261120   ;;  %vm4_vm2 = vcmask 392192   ;;  %vm19_vm3 = vcmask 1048448   ;;  %s202_s0 = inlined_call_operand.vmem [shape: f32[16,48], index: 0, kind: input, shape index: {}]   ;;  %s203_s1 = inlined_call_operand.vmem [shape: f32[1,768], index: 1, kind: output, shape index: {}]  }
   0x1   :  { %v112_v0 = vld [vmem:[%s202_s0 + $0xd] ss:$-8 sm:%s7_s6]   ;;  %s38_s12 = smov 3  ;;  %s23_s15 = smov 3  ;;  %vm42_vm4 = vcmask 1048192   ;;  %vm65_vm5 = vcmask 654592  }
   0x2   :  { %v113_v1 = vld [vmem:[%s202_s0 + $0xd] ss:$-8 sm:%s10_s7]   ;;  %v116_v3 = vld [vmem:[%s202_s0 + $0xf] ss:$-8 sm:%s38_s12]   ;;  %s133_s16 = smov 112   ;;  %s134_s17 = smov 80  }
   0x3   :  { %v13_v2 = vsel %vm12_vm0, %v113_v1, %v112_v0  ;;  %40 = vrot.lane.b32.xlu1 %v116_v3, %s134_s17  ;;  %s26_s18 = smov 3  ;;  %v114_v4 = vld [vmem:[%s202_s0 + $0xa] ss:$-8 sm:%s23_s15]   ;;  %s46_s23 = smov 3  ;;  %vm35_vm6 = vcmask 1048320   ;;  %vm58_vm7 = vcmask 785792  }
   0x4   :  { %14 = vrot.lane.b32.xlu0 %v13_v2, %s133_s16  ;;  %v115_v5 = vld [vmem:[%s202_s0 + $0x2] ss:$8 sm:%s26_s18]   ;;  %s54_s24 = smov 3  ;;  %s135_s29 = smov 48   ;;  %vm50_vm8 = vcmask 916992   ;;  %vm73_vm9 = vcmask 523392  }
   0x5   :  { %v118_v6 = vld [vmem:[%s202_s0 + $0x1] ss:$8 sm:%s54_s24]   ;;  %v29_v7 = vsel %vm16_vm1, %v115_v5, %v114_v4  ;;  %v117_v8 = vld [vmem:[%s202_s0 + $0xc] ss:$-8 sm:%s46_s23]   ;;  %s61_s30 = smov 3  ;;  %s136_s2 = smov 96  }
   0x6   :  { %56 = vrot.lane.b32.xlu2 %v118_v6, %s135_s29  ;;  %s137_s3 = smov 64   ;;  %s69_s4 = smov 3  ;;  %v119_v9 = vld [vmem:[%s202_s0 + $0xe] ss:$-8 sm:%s61_s30]  }
   0x7   :  { %v120_v10 = vld [vmem:[%s202_s0 + $0xb] ss:$-8 sm:%s69_s4]   ;;  %s138_s9 = smov 32   ;;  %s139_s10 = smov 16  }
   0x8   :  { %s2_s11 = smov 3 }
   0x9   :  { %v3_v11 = vld [vmem:[%s202_s0] ss:$8 sm:%s2_s11]  }
   0xa   :  { %5 = vst.msk [vmem:[#allocation0] ss:$24 sm:$0x3] %vm4_vm2, %v3_v11  }
   0xb   :  { %48 = vrot.lane.b32.xlu1 %v117_v8, %s137_s3 }
   0xc   :  { %30 = vrot.lane.b32.xlu0 %v29_v7, %s136_s2 }
   0xe   :  { %63 = vrot.lane.b32.xlu2 %v119_v9, %s138_s9 }
  0x14   :  { %71 = vrot.lane.b32.xlu0 %v120_v10, %s139_s10 }
  0x60   :  { %v57_v12 = vpop.permute.xlu2 %56  }
  0x68   :  { %v64_v13 = vpop.permute.xlu2 %63  }
  0x75   :  { %v41_v15 = vpop.permute.xlu1 %40  }
  0x76   :  { %v15_v14 = vpop.permute.xlu0 %14  }
  0x77   :  { %18 = vst.msk [vmem:[#allocation0 + $0x28] ss:$-24 sm:$0x3] %vm16_vm1, %v15_v14  }
  0x78   :  { %21 = vst.msk [vmem:[#allocation0 + $0x20] ss:$-24 sm:$0x3] %vm19_vm3, %v15_v14  }
  0x79   :  { %44 = vst.msk [vmem:[#allocation0 + $0x28] ss:$-24 sm:$0x3] %vm42_vm4, %v41_v15  }
  0x7a   :  { %67 = vst.msk [vmem:[#allocation0 + $0x28] ss:$-24 sm:$0x3] %vm65_vm5, %v64_v13  }
  0x7d   :  { %v49_v17 = vpop.permute.xlu1 %48  }
  0x7e   :  { %v31_v16 = vpop.permute.xlu0 %30  }
  0x7f   :  { %34 = vst.msk [vmem:[#allocation0 + $0x20] ss:$-24 sm:$0x3] %vm12_vm0, %v31_v16  }
  0x80   :  { %36 = vst.msk [vmem:[#allocation0] ss:$24 sm:$0x3] %vm35_vm6, %v31_v16  }
  0x81   :  { %59 = vst.msk [vmem:[#allocation0] ss:$24 sm:$0x3] %vm58_vm7, %v57_v12   ;;  %v89_v18 = vld [vmem:[#allocation0 + $0x10] sm:$0x1] }
  0x82   :  { %52 = vst.msk [vmem:[#allocation0 + $0x20] ss:$-24 sm:$0x3] %vm50_vm8, %v49_v17   ;;  %v107_v19 = vld [vmem:[#allocation0 + $0x28] sm:$0x1] }
  0x83   :  { %122 = vst [vmem:[%s203_s1 + $0x2] sm:$0x1] %v89_v18 }
  0x84   :  { %125 = vst [vmem:[%s203_s1 + $0x5] sm:$0x1] %v107_v19 }
  0x86   :  { %v72_v20 = vpop.permute.xlu0 %71  }
  0x87   :  { %75 = vst.msk [vmem:[#allocation0 + $0x20] ss:$-24 sm:$0x3] %vm73_vm9, %v72_v20  }
  0x88   :  { %v78_v21 = vld [vmem:[#allocation0] sm:$0x1]  ;;  %v95_v22 = vld [vmem:[#allocation0 + $0x18] sm:$0x1] }
  0x89   :  { %81 = vst [vmem:[%s203_s1] sm:$0x1] %v78_v21 }
  0x8a   :  { %123 = vst [vmem:[%s203_s1 + $0x3] sm:$0x1] %v95_v22 }
  0x8e   :  { %v83_v23 = vld [vmem:[#allocation0 + $0x8] sm:$0x1]  ;;  %v101_v24 = vld [vmem:[#allocation0 + $0x20] sm:$0x1] }
  0x8f   :  { %121 = vst [vmem:[%s203_s1 + $0x1] sm:$0x1] %v83_v23 }
  0x90   :  { %124 = vst [vmem:[%s203_s1 + $0x4] sm:$0x1] %v101_v24 }

// kernel: tile.22
= control target key start
LH: loop header
LB: loop body
LE: loop exit
PB: predicated region body
PF: predicated region fallthrough
CT: control target
= control target key end

     0   :  { %s28_s0 = inlined_call_operand.vmem [shape: f32[16], index: 0, kind: input, shape index: {}]   ;;  %s29_s1 = inlined_call_operand.vmem [shape: f32[16,16], index: 1, kind: output, shape index: {}]  }
   0x1   :  { %v4_v0 = vld [vmem:[%s28_s0] ss:$0 sm:$0xff] }
   0x2   :  { %5 = vst [vmem:[%s29_s1] sm:$0xff] %v4_v0 }
   0x3   :  { %8 = vst [vmem:[%s29_s1 + $0x8] sm:$0xff] %v4_v0 }

// kernel: tile.23
= control target key start
LH: loop header
LB: loop body
LE: loop exit
PB: predicated region body
PF: predicated region fallthrough
CT: control target
= control target key end

     0   :  { %s7_s6 = smov 3  ;;  %s21_s9 = smov 3  ;;  %vm4_vm0 = vcmask 130048   ;;  %vm11_vm1 = vcmask 1048448   ;;  %vm18_vm2 = vcmask 917248   ;;  %vm25_vm3 = vcmask 786048   ;;  %s129_s0 = inlined_call_operand.vmem [shape: f32[16,16], index: 0, kind: input, shape index: {}]   ;;  %s130_s1 = inlined_call_operand.vmem [shape: f32[1,256], index: 1, kind: output, shape index: {}]  }
   0x1   :  { %v67_v0 = vld [vmem:[%s129_s0 + $0x7] ss:$8 sm:%s7_s6]   ;;  %s82_s10 = smov 112   ;;  %v69_v1 = vld [vmem:[%s129_s0 + $0x5] ss:$8 sm:%s21_s9]   ;;  %s83_s13 = smov 80  }
   0x2   :  { %9 = vrot.lane.b32.xlu0 %v67_v0, %s82_s10  ;;  %23 = vrot.lane.b32.xlu1 %v69_v1, %s83_s13  ;;  %s14_s14 = smov 3  ;;  %s28_s15 = smov 3  ;;  %vm32_vm4 = vcmask 654848   ;;  %vm39_vm5 = vcmask 523648   ;;  %vm46_vm6 = vcmask 392448   ;;  %vm53_vm7 = vcmask 261248  }
   0x3   :  { %s35_s16 = smov 3  ;;  %v68_v3 = vld [vmem:[%s129_s0 + $0x6] ss:$8 sm:%s14_s14]   ;;  %s84_s21 = smov 48   ;;  %v70_v4 = vld [vmem:[%s129_s0 + $0x4] ss:$8 sm:%s28_s15]  }
   0x4   :  { %v71_v2 = vld [vmem:[%s129_s0 + $0x3] ss:$8 sm:%s35_s16]   ;;  %s42_s24 = smov 3  ;;  %s85_s25 = smov 96  }
   0x5   :  { %37 = vrot.lane.b32.xlu2 %v71_v2, %s84_s21  ;;  %s86_s26 = smov 64   ;;  %s49_s27 = smov 3  ;;  %v72_v5 = vld [vmem:[%s129_s0 + $0x2] ss:$8 sm:%s42_s24]  }
   0x6   :  { %v73_v6 = vld [vmem:[%s129_s0 + $0x1] ss:$8 sm:%s49_s27]   ;;  %s87_s3 = smov 32   ;;  %s88_s4 = smov 16  }
   0x7   :  { %s2_s5 = smov 3 }
   0x8   :  { %v3_v7 = vld [vmem:[%s129_s0] ss:$8 sm:%s2_s5]  }
   0x9   :  { %5 = vst.msk [vmem:[#allocation0] ss:$8 sm:$0x3] %vm4_vm0, %v3_v7  }
   0xa   :  { %16 = vrot.lane.b32.xlu0 %v68_v3, %s85_s25  ;;  %30 = vrot.lane.b32.xlu1 %v70_v4, %s86_s26 }
   0xd   :  { %44 = vrot.lane.b32.xlu2 %v72_v5, %s87_s3 }
  0x12   :  { %51 = vrot.lane.b32.xlu0 %v73_v6, %s88_s4 }
  0x5f   :  { %v38_v8 = vpop.permute.xlu2 %37  }
  0x67   :  { %v45_v9 = vpop.permute.xlu2 %44  }
  0x74   :  { %v10_v10 = vpop.permute.xlu0 %9   ;;  %v24_v11 = vpop.permute.xlu1 %23  }
  0x75   :  { %12 = vst.msk [vmem:[#allocation0] ss:$8 sm:$0x3] %vm11_vm1, %v10_v10  }
  0x7c   :  { %v17_v12 = vpop.permute.xlu0 %16   ;;  %v31_v13 = vpop.permute.xlu1 %30  }
  0x7d   :  { %19 = vst.msk [vmem:[#allocation0] ss:$8 sm:$0x3] %vm18_vm2, %v17_v12  }
  0x7e   :  { %26 = vst.msk [vmem:[#allocation0] ss:$8 sm:$0x3] %vm25_vm3, %v24_v11  }
  0x7f   :  { %33 = vst.msk [vmem:[#allocation0] ss:$8 sm:$0x3] %vm32_vm4, %v31_v13  }
  0x80   :  { %40 = vst.msk [vmem:[#allocation0] ss:$8 sm:$0x3] %vm39_vm5, %v38_v8  }
  0x81   :  { %47 = vst.msk [vmem:[#allocation0] ss:$8 sm:$0x3] %vm46_vm6, %v45_v9  }
  0x84   :  { %v52_v14 = vpop.permute.xlu0 %51  }
  0x85   :  { %54 = vst.msk [vmem:[#allocation0] ss:$8 sm:$0x3] %vm53_vm7, %v52_v14  }
  0x8c   :  { %v57_v15 = vld [vmem:[#allocation0] sm:$0x1]  ;;  %v62_v16 = vld [vmem:[#allocation0 + $0x8] sm:$0x1] }
  0x8d   :  { %60 = vst [vmem:[%s130_s1] sm:$0x1] %v57_v15 }
  0x8e   :  { %74 = vst [vmem:[%s130_s1 + $0x1] sm:$0x1] %v62_v16 }

// kernel: mul.27
= control target key start
LH: loop header
LB: loop body
LE: loop exit
PB: predicated region body
PF: predicated region fallthrough
CT: control target
= control target key end

     0   :  { %s7_s6 = smov 3  ;;  %s21_s9 = smov 3  ;;  %vm4_vm0 = vcmask 130048   ;;  %vm11_vm1 = vcmask 1048448   ;;  %vm18_vm2 = vcmask 917248   ;;  %vm25_vm3 = vcmask 786048   ;;  %s119_s0 = inlined_call_operand.vmem [shape: f32[16,16], index: 0, kind: input, shape index: {}]   ;;  %s120_s1 = inlined_call_operand.vmem [shape: f32[256], index: 1, kind: output, shape index: {}]  }
   0x1   :  { %v61_v0 = vld [vmem:[%s119_s0 + $0x7] ss:$8 sm:%s7_s6]   ;;  %s75_s10 = smov 112   ;;  %v63_v1 = vld [vmem:[%s119_s0 + $0x5] ss:$8 sm:%s21_s9]   ;;  %s76_s13 = smov 80  }
   0x2   :  { %9 = vrot.lane.b32.xlu0 %v61_v0, %s75_s10  ;;  %23 = vrot.lane.b32.xlu1 %v63_v1, %s76_s13  ;;  %s14_s14 = smov 3  ;;  %s28_s15 = smov 3  ;;  %vm32_vm4 = vcmask 654848   ;;  %vm39_vm5 = vcmask 523648   ;;  %vm46_vm6 = vcmask 392448   ;;  %vm53_vm7 = vcmask 261248  }
   0x3   :  { %s35_s16 = smov 3  ;;  %v62_v3 = vld [vmem:[%s119_s0 + $0x6] ss:$8 sm:%s14_s14]   ;;  %s77_s21 = smov 48   ;;  %v64_v4 = vld [vmem:[%s119_s0 + $0x4] ss:$8 sm:%s28_s15]  }
   0x4   :  { %v65_v2 = vld [vmem:[%s119_s0 + $0x3] ss:$8 sm:%s35_s16]   ;;  %s42_s24 = smov 3  ;;  %s78_s25 = smov 96  }
   0x5   :  { %37 = vrot.lane.b32.xlu2 %v65_v2, %s77_s21  ;;  %s79_s26 = smov 64   ;;  %s49_s27 = smov 3  ;;  %v66_v5 = vld [vmem:[%s119_s0 + $0x2] ss:$8 sm:%s42_s24]  }
   0x6   :  { %v67_v6 = vld [vmem:[%s119_s0 + $0x1] ss:$8 sm:%s49_s27]   ;;  %s80_s3 = smov 32   ;;  %s81_s4 = smov 16  }
   0x7   :  { %s2_s5 = smov 3 }
   0x8   :  { %v3_v7 = vld [vmem:[%s119_s0] ss:$8 sm:%s2_s5]  }
   0x9   :  { %5 = vst.msk [vmem:[#allocation0] sm:$0x3] %vm4_vm0, %v3_v7  }
   0xa   :  { %16 = vrot.lane.b32.xlu0 %v62_v3, %s78_s25  ;;  %30 = vrot.lane.b32.xlu1 %v64_v4, %s79_s26 }
   0xd   :  { %44 = vrot.lane.b32.xlu2 %v66_v5, %s80_s3 }
  0x12   :  { %51 = vrot.lane.b32.xlu0 %v67_v6, %s81_s4 }
  0x5f   :  { %v38_v8 = vpop.permute.xlu2 %37  }
  0x67   :  { %v45_v9 = vpop.permute.xlu2 %44  }
  0x74   :  { %v10_v10 = vpop.permute.xlu0 %9   ;;  %v24_v11 = vpop.permute.xlu1 %23  }
  0x75   :  { %12 = vst.msk [vmem:[#allocation0] sm:$0x3] %vm11_vm1, %v10_v10  }
  0x7c   :  { %v17_v12 = vpop.permute.xlu0 %16   ;;  %v31_v13 = vpop.permute.xlu1 %30  }
  0x7d   :  { %19 = vst.msk [vmem:[#allocation0] sm:$0x3] %vm18_vm2, %v17_v12  }
  0x7e   :  { %26 = vst.msk [vmem:[#allocation0] sm:$0x3] %vm25_vm3, %v24_v11  }
  0x7f   :  { %33 = vst.msk [vmem:[#allocation0] sm:$0x3] %vm32_vm4, %v31_v13  }
  0x80   :  { %40 = vst.msk [vmem:[#allocation0] sm:$0x3] %vm39_vm5, %v38_v8  }
  0x81   :  { %47 = vst.msk [vmem:[#allocation0] sm:$0x3] %vm46_vm6, %v45_v9  }
  0x84   :  { %v52_v14 = vpop.permute.xlu0 %51  }
  0x85   :  { %54 = vst.msk [vmem:[#allocation0] sm:$0x3] %vm53_vm7, %v52_v14  }
  0x8c   :  { %v57_v15 = vld [vmem:[#allocation0] sm:$0x3] }
  0x8d   :  { %60 = vst [vmem:[%s120_s1] sm:$0x3] %v57_v15 }

// kernel: decoder_forward.1
= control target key start
LH: loop header
LB: loop body
LE: loop exit
PB: predicated region body
PF: predicated region fallthrough
CT: control target
= control target key end

     0   :  { %vm601_vm0 = vcmask 261120   ;;  %s4138_s1 = inlined_call_operand.vmem [shape: bf16[672,256], index: 1, kind: input, shape index: {}]   ;;  %s4139_s0 = inlined_call_operand.vmem [shape: bf16[32,672], index: 0, kind: input, shape index: {}]   ;;  %s4140_s3 = inlined_call_operand.vmem [shape: bf16[256,768], index: 3, kind: input, shape index: {}]   ;;  %s4141_s2 = inlined_call_operand.vmem [shape: f32[1,256], index: 2, kind: input, shape index: {}]   ;;  %s4142_s4 = inlined_call_operand.vmem [shape: f32[1,768], index: 4, kind: input, shape index: {}]   ;;  %s4143_s5 = inlined_call_operand.vmem [shape: f32[32,768], index: 5, kind: output, shape index: {}]  }
   0x1   :  { %v1856_v0 = vld [vmem:[%s4138_s1 + $0x70] sm:$0xf]  ;;  %v2549_v1 = vld [vmem:[%s4138_s1 + $0x74] sm:$0xf0]  ;;  %v1848_v11 = vld [vmem:[%s4138_s1 + $0x60] sm:$0xf] }
   0x2   :  { %v1920_v2 = vld [vmem:[%s4138_s1 + $0xf0] sm:$0xf]  ;;  %v1857_v3 = vor.u32 %v2549_v1, %v1856_v0  ;;  %v2565_v4 = vld [vmem:[%s4138_s1 + $0xf4] sm:$0xf0]  ;;  %v2547_v13 = vld [vmem:[%s4138_s1 + $0x64] sm:$0xf0] }
   0x3   :  { %v1984_v5 = vld [vmem:[%s4138_s1 + $0x170] sm:$0xf]  ;;  %v2581_v6 = vld [vmem:[%s4138_s1 + $0x174] sm:$0xf0]  ;;  %v1921_v7 = vor.u32 %v2565_v4, %v1920_v2  ;;  %v1912_v14 = vld [vmem:[%s4138_s1 + $0xe0] sm:$0xf]  ;;  %v1849_v16 = vor.u32 %v2547_v13, %v1848_v11 }
   0x4   :  { %v1985_v8 = vor.u32 %v2581_v6, %v1984_v5  ;;  %v2048_v9 = vld [vmem:[%s4138_s1 + $0x1f0] sm:$0xf]  ;;  %v2597_v10 = vld [vmem:[%s4138_s1 + $0x1f4] sm:$0xf0]  ;;  %608 = vmatpush.bf16.msra.mxu0 %v1857_v3  ;;  %v2563_v15 = vld [vmem:[%s4138_s1 + $0xe4] sm:$0xf0] }
   0x5   :  { %v2049_v12 = vor.u32 %v2597_v10, %v2048_v9  ;;  %627 = vmatpush.bf16.msra.mxu1 %v1921_v7  ;;  %v1913_v17 = vor.u32 %v2563_v15, %v1912_v14  ;;  %v1976_v18 = vld [vmem:[%s4138_s1 + $0x160] sm:$0xf]  ;;  %v2579_v19 = vld [vmem:[%s4138_s1 + $0x164] sm:$0xf0]  ;;  %v1840_v23 = vld [vmem:[%s4138_s1 + $0x50] sm:$0xf] }
   0x6   :  { %646 = vmatpush.bf16.msra.mxu2 %v1985_v8  ;;  %v2040_v20 = vld [vmem:[%s4138_s1 + $0x1e0] sm:$0xf]  ;;  %v1977_v21 = vor.u32 %v2579_v19, %v1976_v18  ;;  %v2595_v22 = vld [vmem:[%s4138_s1 + $0x1e4] sm:$0xf0]  ;;  %v2545_v24 = vld [vmem:[%s4138_s1 + $0x54] sm:$0xf0] }
   0x7   :  { %665 = vmatpush.bf16.msra.mxu3 %v2049_v12  ;;  %v2041_v25 = vor.u32 %v2595_v22, %v2040_v20  ;;  %v1904_v26 = vld [vmem:[%s4138_s1 + $0xd0] sm:$0xf]  ;;  %v2561_v27 = vld [vmem:[%s4138_s1 + $0xd4] sm:$0xf0]  ;;  %v1841_v29 = vor.u32 %v2545_v24, %v1840_v23  ;;  %v1832_v35 = vld [vmem:[%s4138_s1 + $0x40] sm:$0xf] }
   0x8   :  { %v1968_v28 = vld [vmem:[%s4138_s1 + $0x150] sm:$0xf]  ;;  %609 = vmatpush.bf16.msra.mxu0 %v1849_v16  ;;  %v2577_v30 = vld [vmem:[%s4138_s1 + $0x154] sm:$0xf0]  ;;  %v1905_v33 = vor.u32 %v2561_v27, %v1904_v26  ;;  %v2543_v36 = vld [vmem:[%s4138_s1 + $0x44] sm:$0xf0] }
   0x9   :  { %v2032_v31 = vld [vmem:[%s4138_s1 + $0x1d0] sm:$0xf]  ;;  %v2593_v32 = vld [vmem:[%s4138_s1 + $0x1d4] sm:$0xf0]  ;;  %628 = vmatpush.bf16.msra.mxu1 %v1913_v17  ;;  %v1969_v34 = vor.u32 %v2577_v30, %v1968_v28  ;;  %v1896_v37 = vld [vmem:[%s4138_s1 + $0xc0] sm:$0xf]  ;;  %v1833_v44 = vor.u32 %v2543_v36, %v1832_v35 }
   0xa   :  { %647 = vmatpush.bf16.msra.mxu2 %v1977_v21  ;;  %v2033_v38 = vor.u32 %v2593_v32, %v2032_v31  ;;  %v2559_v39 = vld [vmem:[%s4138_s1 + $0xc4] sm:$0xf0]  ;;  %v1960_v40 = vld [vmem:[%s4138_s1 + $0x140] sm:$0xf]  ;;  %v1824_v47 = vld [vmem:[%s4138_s1 + $0x30] sm:$0xf] }
   0xb   :  { %666 = vmatpush.bf16.msra.mxu3 %v2041_v25  ;;  %v2575_v41 = vld [vmem:[%s4138_s1 + $0x144] sm:$0xf0]  ;;  %v2024_v42 = vld [vmem:[%s4138_s1 + $0x1c0] sm:$0xf]  ;;  %v1897_v45 = vor.u32 %v2559_v39, %v1896_v37  ;;  %v2541_v48 = vld [vmem:[%s4138_s1 + $0x34] sm:$0xf0] }
   0xc   :  { %v2591_v43 = vld [vmem:[%s4138_s1 + $0x1c4] sm:$0xf0]  ;;  %610 = vmatpush.bf16.msra.mxu0 %v1841_v29  ;;  %v1961_v46 = vor.u32 %v2575_v41, %v1960_v40  ;;  %v1888_v49 = vld [vmem:[%s4138_s1 + $0xb0] sm:$0xf]  ;;  %v2557_v51 = vld [vmem:[%s4138_s1 + $0xb4] sm:$0xf0]  ;;  %v1825_v56 = vor.u32 %v2541_v48, %v1824_v47 }
   0xd   :  { %629 = vmatpush.bf16.msra.mxu1 %v1905_v33  ;;  %v2025_v50 = vor.u32 %v2591_v43, %v2024_v42  ;;  %v1952_v52 = vld [vmem:[%s4138_s1 + $0x130] sm:$0xf]  ;;  %v2573_v53 = vld [vmem:[%s4138_s1 + $0x134] sm:$0xf0]  ;;  %v1889_v57 = vor.u32 %v2557_v51, %v1888_v49  ;;  %v1816_v59 = vld [vmem:[%s4138_s1 + $0x20] sm:$0xf] }
   0xe   :  { %648 = vmatpush.bf16.msra.mxu2 %v1969_v34  ;;  %v2016_v54 = vld [vmem:[%s4138_s1 + $0x1b0] sm:$0xf]  ;;  %v2589_v55 = vld [vmem:[%s4138_s1 + $0x1b4] sm:$0xf0]  ;;  %v1953_v58 = vor.u32 %v2573_v53, %v1952_v52  ;;  %v2539_v60 = vld [vmem:[%s4138_s1 + $0x24] sm:$0xf0] }
   0xf   :  { %667 = vmatpush.bf16.msra.mxu3 %v2033_v38  ;;  %v1880_v61 = vld [vmem:[%s4138_s1 + $0xa0] sm:$0xf]  ;;  %v2017_v62 = vor.u32 %v2589_v55, %v2016_v54  ;;  %v2555_v63 = vld [vmem:[%s4138_s1 + $0xa4] sm:$0xf0]  ;;  %v1817_v4 = vor.u32 %v2539_v60, %v1816_v59  ;;  %v1808_v7 = vld [vmem:[%s4138_s1 + $0x10] sm:$0xf] }
  0x10   :  { %611 = vmatpush.bf16.msra.mxu0 %v1833_v44  ;;  %v1944_v0 = vld [vmem:[%s4138_s1 + $0x120] sm:$0xf]  ;;  %v2571_v1 = vld [vmem:[%s4138_s1 + $0x124] sm:$0xf0]  ;;  %v1881_v5 = vor.u32 %v2555_v63, %v1880_v61  ;;  %v2537_v8 = vld [vmem:[%s4138_s1 + $0x14] sm:$0xf0] }
  0x11   :  { %630 = vmatpush.bf16.msra.mxu1 %v1897_v45  ;;  %v2008_v2 = vld [vmem:[%s4138_s1 + $0x1a0] sm:$0xf]  ;;  %v2587_v3 = vld [vmem:[%s4138_s1 + $0x1a4] sm:$0xf0]  ;;  %v1945_v6 = vor.u32 %v2571_v1, %v1944_v0  ;;  %v1872_v9 = vld [vmem:[%s4138_s1 + $0x90] sm:$0xf]  ;;  %v1809_v17 = vor.u32 %v2537_v8, %v1808_v7 }
  0x12   :  { %649 = vmatpush.bf16.msra.mxu2 %v1961_v46  ;;  %v2009_v10 = vor.u32 %v2587_v3, %v2008_v2  ;;  %v2553_v11 = vld [vmem:[%s4138_s1 + $0x94] sm:$0xf0]  ;;  %v1936_v12 = vld [vmem:[%s4138_s1 + $0x110] sm:$0xf]  ;;  %v1800_v16 = vld [vmem:[%s4138_s1] sm:$0xf] }
  0x13   :  { %668 = vmatpush.bf16.msra.mxu3 %v2025_v50  ;;  %v2569_v13 = vld [vmem:[%s4138_s1 + $0x114] sm:$0xf0]  ;;  %v2000_v14 = vld [vmem:[%s4138_s1 + $0x190] sm:$0xf]  ;;  %v2535_v18 = vld [vmem:[%s4138_s1 + $0x4] sm:$0xf0]  ;;  %v1873_v21 = vor.u32 %v2553_v11, %v1872_v9 }
  0x14   :  { %612 = vmatpush.bf16.msra.mxu0 %v1825_v56  ;;  %v2585_v15 = vld [vmem:[%s4138_s1 + $0x194] sm:$0xf0]  ;;  %v1864_v19 = vld [vmem:[%s4138_s1 + $0x80] sm:$0xf]  ;;  %v2551_v20 = vld [vmem:[%s4138_s1 + $0x84] sm:$0xf0]  ;;  %v1937_v22 = vor.u32 %v2569_v13, %v1936_v12  ;;  %v1801_v34 = vor.u32 %v2535_v18, %v1800_v16 }
  0x15   :  { %631 = vmatpush.bf16.msra.mxu1 %v1889_v57  ;;  %v1928_v23 = vld [vmem:[%s4138_s1 + $0x100] sm:$0xf]  ;;  %v2567_v24 = vld [vmem:[%s4138_s1 + $0x104] sm:$0xf0]  ;;  %v2001_v26 = vor.u32 %v2585_v15, %v2000_v14  ;;  %v2525_v29 = vld [vmem:[%s4139_s0 + $0x14] sm:$0xf0]  ;;  %v1865_v38 = vor.u32 %v2551_v20, %v1864_v19 }
  0x16   :  { %650 = vmatpush.bf16.msra.mxu2 %v1953_v58  ;;  %v1992_v25 = vld [vmem:[%s4138_s1 + $0x180] sm:$0xf]  ;;  %v2583_v27 = vld [vmem:[%s4138_s1 + $0x184] sm:$0xf0]  ;;  %v2522_v30 = vld [vmem:[%s4139_s0 + $0x4] sm:$0xf]  ;;  %v1929_v39 = vor.u32 %v2567_v24, %v1928_v23 }
  0x17   :  { %669 = vmatpush.bf16.msra.mxu3 %v2017_v62  ;;  %v1752_v28 = vld [vmem:[%s4139_s0] sm:$0xf]  ;;  %v1754_v31 = vld [vmem:[%s4139_s0 + $0x18] sm:$0xf0]  ;;  %v2548_v32 = vld [vmem:[%s4138_s1 + $0x74] sm:$0xf]  ;;  %v1993_v43 = vor.u32 %v2583_v27, %v1992_v25 }
  0x18   :  { %613 = vmatpush.bf16.msra.mxu0 %v1817_v4  ;;  %v1858_v33 = vld [vmem:[%s4138_s1 + $0x78] sm:$0xf0]  ;;  %v1760_v35 = vld [vmem:[%s4139_s0 + $0x8] sm:$0xf]  ;;  %v2564_v36 = vld [vmem:[%s4138_s1 + $0xf4] sm:$0xf]  ;;  %v2981_v48 = vor.u32 %v2525_v29, %v1752_v28  ;;  %v2992_v53 = vor.u32 %v2522_v30, %v1754_v31 }
  0x19   :  { %632 = vmatpush.bf16.msra.mxu1 %v1881_v5  ;;  %v1922_v37 = vld [vmem:[%s4138_s1 + $0xf8] sm:$0xf0]  ;;  %v2526_v40 = vld [vmem:[%s4139_s0 + $0x1c] sm:$0xf0]  ;;  %v2523_v41 = vld [vmem:[%s4139_s0 + $0xc] sm:$0xf]  ;;  %v1861_v44 = vor.u32 %v2548_v32, %v1858_v33 }
  0x1a   :  { %651 = vmatpush.bf16.msra.mxu2 %v1945_v6  ;;  %v1762_v42 = vld [vmem:[%s4139_s0 + $0x20] sm:$0xf0]  ;;  %v2112_v45 = vld [vmem:[%s4138_s1 + $0x270] sm:$0xf]  ;;  %v2613_v46 = vld [vmem:[%s4138_s1 + $0x274] sm:$0xf0]  ;;  %v1925_v49 = vor.u32 %v2564_v36, %v1922_v37  ;;  %v2994_v54 = vor.u32 %v2526_v40, %v1760_v35 }
  0x1b   :  { %670 = vmatpush.bf16.msra.mxu3 %v2009_v10  ;;  %v2128_v47 = vld [vmem:[%s4138_s1 + $0x290] sm:$0xf]  ;;  %v2617_v50 = vld [vmem:[%s4138_s1 + $0x294] sm:$0xf0]  ;;  %v2546_v51 = vld [vmem:[%s4138_s1 + $0x64] sm:$0xf]  ;;  %v3002_v57 = vor.u32 %v2523_v41, %v1762_v42  ;;  %v2113_v58 = vor.u32 %v2613_v46, %v2112_v45 }
  0x1c   :  { %614 = vmatpush.bf16.msra.mxu0 %v1809_v17  ;;  %v1850_v52 = vld [vmem:[%s4138_s1 + $0x68] sm:$0xf0]  ;;  %v2562_v55 = vld [vmem:[%s4138_s1 + $0xe4] sm:$0xf]  ;;  %v2129_v59 = vor.u32 %v2617_v50, %v2128_v47  ;;  %v2104_v61 = vld [vmem:[%s4138_s1 + $0x260] sm:$0xf] }
  0x1d   :  { %633 = vmatpush.bf16.msra.mxu1 %v1873_v21  ;;  %v1914_v56 = vld [vmem:[%s4138_s1 + $0xe8] sm:$0xf0]  ;;  %v1853_v60 = vor.u32 %v2546_v51, %v1850_v52  ;;  %v2611_v62 = vld [vmem:[%s4138_s1 + $0x264] sm:$0xf0]  ;;  %v2544_v0 = vld [vmem:[%s4138_s1 + $0x54] sm:$0xf] }
  0x1e   :  { %652 = vmatpush.bf16.msra.mxu2 %v1937_v22  ;;  %v1917_v63 = vor.u32 %v2562_v55, %v1914_v56  ;;  %v1842_v1 = vld [vmem:[%s4138_s1 + $0x58] sm:$0xf0]  ;;  %v2560_v2 = vld [vmem:[%s4138_s1 + $0xd4] sm:$0xf]  ;;  %v2105_v4 = vor.u32 %v2611_v62, %v2104_v61  ;;  %v2096_v5 = vld [vmem:[%s4138_s1 + $0x250] sm:$0xf] }
  0x1f   :  { %671 = vmatpush.bf16.msra.mxu3 %v2001_v26  ;;  %v1906_v3 = vld [vmem:[%s4138_s1 + $0xd8] sm:$0xf0]  ;;  %v1845_v6 = vor.u32 %v2544_v0, %v1842_v1  ;;  %v2609_v7 = vld [vmem:[%s4138_s1 + $0x254] sm:$0xf0]  ;;  %v2120_v8 = vld [vmem:[%s4138_s1 + $0x280] sm:$0xf] }
  0x20   :  { %615 = vmatpush.bf16.msra.mxu0 %v1801_v34  ;;  %v2615_v9 = vld [vmem:[%s4138_s1 + $0x284] sm:$0xf0]  ;;  %v1909_v10 = vor.u32 %v2560_v2, %v1906_v3  ;;  %v2542_v11 = vld [vmem:[%s4138_s1 + $0x44] sm:$0xf]  ;;  %v1834_v12 = vld [vmem:[%s4138_s1 + $0x48] sm:$0xf0]  ;;  %v2097_v16 = vor.u32 %v2609_v7, %v2096_v5 }
  0x21   :  { %634 = vmatpush.bf16.msra.mxu1 %v1865_v38  ;;  %v2121_v13 = vor.u32 %v2615_v9, %v2120_v8  ;;  %v2558_v14 = vld [vmem:[%s4138_s1 + $0xc4] sm:$0xf]  ;;  %v1898_v15 = vld [vmem:[%s4138_s1 + $0xc8] sm:$0xf0]  ;;  %v2088_v17 = vld [vmem:[%s4138_s1 + $0x240] sm:$0xf]  ;;  %v1837_v18 = vor.u32 %v2542_v11, %v1834_v12 }
  0x22   :  { %653 = vmatpush.bf16.msra.mxu2 %v1929_v39  ;;  %v2607_v19 = vld [vmem:[%s4138_s1 + $0x244] sm:$0xf0]  ;;  %v1776_v20 = vld [vmem:[%s4139_s0 + $0x30] sm:$0xf]  ;;  %v1901_v22 = vor.u32 %v2558_v14, %v1898_v15  ;;  %v2528_v23 = vld [vmem:[%s4139_s0 + $0x34] sm:$0xf] }
  0x23   :  { %672 = vmatpush.bf16.msra.mxu3 %v1993_v43  ;;  %616 = vmatmul.bf16.vlgmr.msra.gmra.mxu0 %v2981_v48  ;;  %v2531_v21 = vld [vmem:[%s4139_s0 + $0x44] sm:$0xf0]  ;;  %v2540_v24 = vld [vmem:[%s4138_s1 + $0x34] sm:$0xf]  ;;  %v1826_v25 = vld [vmem:[%s4138_s1 + $0x38] sm:$0xf0]  ;;  %v2089_v29 = vor.u32 %v2607_v19, %v2088_v17 }
  0x24   :  { %635 = vmatmul.bf16.vlgmr.msra.gmra.mxu1 %v2992_v53  ;;  %684 = vmatpush.bf16.msrb.mxu0 %v2113_v58  ;;  %v1778_v26 = vld [vmem:[%s4139_s0 + $0x48] sm:$0xf0]  ;;  %v2556_v27 = vld [vmem:[%s4138_s1 + $0xb4] sm:$0xf]  ;;  %v1890_v28 = vld [vmem:[%s4138_s1 + $0xb8] sm:$0xf0]  ;;  %v1829_v34 = vor.u32 %v2540_v24, %v1826_v25  ;;  %v3098_v37 = vor.u32 %v2531_v21, %v1776_v20 }
  0x25   :  { %654 = vmatmul.bf16.vlgmr.msra.gmra.mxu2 %v2994_v54  ;;  %709 = vmatpush.bf16.msrb.mxu1 %v2129_v59  ;;  %v1784_v30 = vld [vmem:[%s4139_s0 + $0x38] sm:$0xf]  ;;  %v2532_v31 = vld [vmem:[%s4139_s0 + $0x4c] sm:$0xf0]  ;;  %v2529_v32 = vld [vmem:[%s4139_s0 + $0x3c] sm:$0xf]  ;;  %v1893_v38 = vor.u32 %v2556_v27, %v1890_v28  ;;  %v3109_v42 = vor.u32 %v2528_v23, %v1778_v26 }
  0x26   :  { %722 = vmatpush.bf16.msrb.mxu2 %v1861_v44  ;;  %673 = vmatmul.bf16.vlgmr.msra.gmra.mxu3 %v3002_v57  ;;  %v1786_v33 = vld [vmem:[%s4139_s0 + $0x50] sm:$0xf0]  ;;  %v2080_v35 = vld [vmem:[%s4138_s1 + $0x230] sm:$0xf]  ;;  %v2605_v36 = vld [vmem:[%s4138_s1 + $0x234] sm:$0xf0]  ;;  %v3111_v43 = vor.u32 %v2532_v31, %v1784_v30 }
  0x27   :  { %741 = vmatpush.bf16.msrb.mxu3 %v1925_v49  ;;  %v2538_v39 = vld [vmem:[%s4138_s1 + $0x24] sm:$0xf]  ;;  %v1818_v40 = vld [vmem:[%s4138_s1 + $0x28] sm:$0xf0]  ;;  %v2596_v45 = vld [vmem:[%s4138_s1 + $0x1f4] sm:$0xf]  ;;  %v3122_v47 = vor.u32 %v2529_v32, %v1786_v33  ;;  %v2081_v49 = vor.u32 %v2605_v36, %v2080_v35 }
  0x28   :  { %685 = vmatpush.bf16.msrb.mxu0 %v2105_v4  ;;  %v2554_v41 = vld [vmem:[%s4138_s1 + $0xa4] sm:$0xf]  ;;  %v1882_v44 = vld [vmem:[%s4138_s1 + $0xa8] sm:$0xf0]  ;;  %v2050_v46 = vld [vmem:[%s4138_s1 + $0x1f8] sm:$0xf0]  ;;  %v1821_v50 = vor.u32 %v2538_v39, %v1818_v40 }
  0x29   :  { %710 = vmatpush.bf16.msrb.mxu1 %v2121_v13  ;;  %v2072_v51 = vld [vmem:[%s4138_s1 + $0x220] sm:$0xf]  ;;  %v2603_v52 = vld [vmem:[%s4138_s1 + $0x224] sm:$0xf0]  ;;  %v2536_v55 = vld [vmem:[%s4138_s1 + $0x14] sm:$0xf]  ;;  %v2053_v56 = vor.u32 %v2596_v45, %v2050_v46  ;;  %v1885_v58 = vor.u32 %v2554_v41, %v1882_v44 }
  0x2a   :  { %723 = vmatpush.bf16.msrb.mxu2 %v1853_v60  ;;  %v1810_v59 = vld [vmem:[%s4138_s1 + $0x18] sm:$0xf0]  ;;  %v2594_v60 = vld [vmem:[%s4138_s1 + $0x1e4] sm:$0xf]  ;;  %v2042_v61 = vld [vmem:[%s4138_s1 + $0x1e8] sm:$0xf0]  ;;  %v2073_v0 = vor.u32 %v2603_v52, %v2072_v51 }
  0x2b   :  { %742 = vmatpush.bf16.msrb.mxu3 %v1917_v63  ;;  %v2552_v62 = vld [vmem:[%s4138_s1 + $0x94] sm:$0xf]  ;;  %v1874_v63 = vld [vmem:[%s4138_s1 + $0x98] sm:$0xf0]  ;;  %v2064_v1 = vld [vmem:[%s4138_s1 + $0x210] sm:$0xf]  ;;  %v1813_v2 = vor.u32 %v2536_v55, %v1810_v59 }
  0x2c   :  { %686 = vmatpush.bf16.msrb.mxu0 %v2097_v16  ;;  %v2601_v3 = vld [vmem:[%s4138_s1 + $0x214] sm:$0xf0]  ;;  %v2534_v4 = vld [vmem:[%s4138_s1 + $0x4] sm:$0xf]  ;;  %v1802_v5 = vld [vmem:[%s4138_s1 + $0x8] sm:$0xf0]  ;;  %v1877_v7 = vor.u32 %v2552_v62, %v1874_v63 }
  0x2d   :  { %779 = vmatpush.bf16.msra.mxu1 %v2053_v56  ;;  %v2550_v8 = vld [vmem:[%s4138_s1 + $0x84] sm:$0xf]  ;;  %v2592_v9 = vld [vmem:[%s4138_s1 + $0x1d4] sm:$0xf]  ;;  %v1866_v11 = vld [vmem:[%s4138_s1 + $0x88] sm:$0xf0]  ;;  %v2065_v14 = vor.u32 %v2601_v3, %v2064_v1  ;;  %v1805_v17 = vor.u32 %v2534_v4, %v1802_v5 }
  0x2e   :  { %724 = vmatpush.bf16.msrb.mxu2 %v1845_v6  ;;  %v2045_v6 = vor.u32 %v2594_v60, %v2042_v61  ;;  %v2612_v12 = vld [vmem:[%s4138_s1 + $0x274] sm:$0xf]  ;;  %v2114_v13 = vld [vmem:[%s4138_s1 + $0x278] sm:$0xf0]  ;;  %v2599_v19 = vld [vmem:[%s4138_s1 + $0x204] sm:$0xf0] }
  0x2f   :  { %743 = vmatpush.bf16.msrb.mxu3 %v1909_v10  ;;  %v2034_v10 = vld [vmem:[%s4138_s1 + $0x1d8] sm:$0xf0]  ;;  %v2616_v15 = vld [vmem:[%s4138_s1 + $0x294] sm:$0xf]  ;;  %v2117_v23 = vor.u32 %v2612_v12, %v2114_v13  ;;  %v2590_v25 = vld [vmem:[%s4138_s1 + $0x1c4] sm:$0xf] }
  0x30   :  { %687 = vmatpush.bf16.msrb.mxu0 %v2089_v29  ;;  %v2130_v16 = vld [vmem:[%s4138_s1 + $0x298] sm:$0xf0]  ;;  %v2580_v20 = vld [vmem:[%s4138_s1 + $0x174] sm:$0xf]  ;;  %v2037_v21 = vor.u32 %v2592_v9, %v2034_v10  ;;  %v2026_v26 = vld [vmem:[%s4138_s1 + $0x1c8] sm:$0xf0] }
  0x31   :  { %780 = vmatpush.bf16.msra.mxu1 %v2045_v6  ;;  %v1986_v24 = vld [vmem:[%s4138_s1 + $0x178] sm:$0xf0]  ;;  %v1768_v27 = vld [vmem:[%s4139_s0 + $0x10] sm:$0xf]  ;;  %v2133_v28 = vor.u32 %v2616_v15, %v2130_v16  ;;  %v2610_v29 = vld [vmem:[%s4138_s1 + $0x264] sm:$0xf]  ;;  %v2029_v39 = vor.u32 %v2590_v25, %v2026_v26 }
  0x32   :  { %725 = vmatpush.bf16.msrb.mxu2 %v1837_v18  ;;  %v2056_v18 = vld [vmem:[%s4138_s1 + $0x200] sm:$0xf]  ;;  %v2106_v30 = vld [vmem:[%s4138_s1 + $0x268] sm:$0xf0]  ;;  %v2527_v32 = vld [vmem:[%s4139_s0 + $0x24] sm:$0xf0]  ;;  %v1989_v35 = vor.u32 %v2580_v20, %v1986_v24 }
  0x33   :  { %744 = vmatpush.bf16.msrb.mxu3 %v1901_v22  ;;  %621 = vmatmul.bf16.gmra.mxu0 %v3098_v37  ;;  %v1869_v22 = vor.u32 %v2550_v8, %v1866_v11  ;;  %v2057_v31 = vor.u32 %v2599_v19, %v2056_v18  ;;  %v2524_v33 = vld [vmem:[%s4139_s0 + $0x14] sm:$0xf]  ;;  %v2578_v36 = vld [vmem:[%s4138_s1 + $0x164] sm:$0xf]  ;;  %v2109_v40 = vor.u32 %v2610_v29, %v2106_v30  ;;  %v2018_v45 = vld [vmem:[%s4138_s1 + $0x1b8] sm:$0xf0] }
  0x34   :  { %640 = vmatmul.bf16.gmra.mxu1 %v3109_v42  ;;  %688 = vmatpush.bf16.msrb.mxu0 %v2081_v49  ;;  %v2608_v41 = vld [vmem:[%s4138_s1 + $0x254] sm:$0xf]  ;;  %v3239_v46 = vor.u32 %v2527_v32, %v1768_v27  ;;  %v2614_v51 = vld [vmem:[%s4138_s1 + $0x284] sm:$0xf]  ;;  %v2122_v52 = vld [vmem:[%s4138_s1 + $0x288] sm:$0xf0] }
  0x35   :  { %659 = vmatmul.bf16.gmra.mxu2 %v3111_v43  ;;  %781 = vmatpush.bf16.msra.mxu1 %v2037_v21  ;;  %v2588_v44 = vld [vmem:[%s4138_s1 + $0x1b4] sm:$0xf]  ;;  %v1970_v60 = vld [vmem:[%s4138_s1 + $0x158] sm:$0xf0]  ;;  %v2125_v61 = vor.u32 %v2614_v51, %v2122_v52  ;;  %v2586_v62 = vld [vmem:[%s4138_s1 + $0x1a4] sm:$0xf] }
  0x36   :  { %726 = vmatpush.bf16.msrb.mxu2 %v1829_v34  ;;  %678 = vmatmul.bf16.gmra.mxu3 %v3122_v47  ;;  %v1770_v34 = vld [vmem:[%s4139_s0 + $0x28] sm:$0xf0]  ;;  %v2576_v56 = vld [vmem:[%s4138_s1 + $0x154] sm:$0xf]  ;;  %v2574_v3 = vld [vmem:[%s4138_s1 + $0x144] sm:$0xf] }
  0x37   :  { %745 = vmatpush.bf16.msrb.mxu3 %v1893_v38  ;;  %v1978_v38 = vld [vmem:[%s4138_s1 + $0x168] sm:$0xf0]  ;;  %v3241_v49 = vor.u32 %v2524_v33, %v1770_v34  ;;  %v2082_v8 = vld [vmem:[%s4138_s1 + $0x238] sm:$0xf0]  ;;  %v2572_v10 = vld [vmem:[%s4138_s1 + $0x134] sm:$0xf] }
  0x38   :  { %689 = vmatpush.bf16.msrb.mxu0 %v2073_v0  ;;  %v1981_v55 = vor.u32 %v2578_v36, %v1978_v38  ;;  %v2010_v63 = vld [vmem:[%s4138_s1 + $0x1a8] sm:$0xf0]  ;;  %v2606_v0 = vld [vmem:[%s4138_s1 + $0x244] sm:$0xf]  ;;  %v1954_v13 = vld [vmem:[%s4138_s1 + $0x138] sm:$0xf0] }
  0x39   :  { %782 = vmatpush.bf16.msra.mxu1 %v2029_v39  ;;  %v2090_v1 = vld [vmem:[%s4138_s1 + $0x248] sm:$0xf0]  ;;  %v2013_v4 = vor.u32 %v2586_v62, %v2010_v63  ;;  %v1792_v16 = vld [vmem:[%s4139_s0 + $0x40] sm:$0xf]  ;;  %v2533_v19 = vld [vmem:[%s4139_s0 + $0x54] sm:$0xf0] }
  0x3a   :  { %727 = vmatpush.bf16.msrb.mxu2 %v1821_v50  ;;  %v2098_v50 = vld [vmem:[%s4138_s1 + $0x258] sm:$0xf0]  ;;  %v2093_v5 = vor.u32 %v2606_v0, %v2090_v1  ;;  %v1962_v6 = vld [vmem:[%s4138_s1 + $0x148] sm:$0xf0]  ;;  %v2530_v20 = vld [vmem:[%s4139_s0 + $0x44] sm:$0xf]  ;;  %v1793_v27 = vor.u32 %v2533_v19, %v1792_v16 }
  0x3b   :  { %746 = vmatpush.bf16.msrb.mxu3 %v1885_v58  ;;  %v2021_v58 = vor.u32 %v2588_v44, %v2018_v45  ;;  %v2101_v59 = vor.u32 %v2608_v41, %v2098_v50  ;;  %v1965_v9 = vor.u32 %v2574_v3, %v1962_v6  ;;  %v1994_v15 = vld [vmem:[%s4138_s1 + $0x188] sm:$0xf0]  ;;  %v1794_v21 = vld [vmem:[%s4139_s0 + $0x58] sm:$0xf0]  ;;  %v2570_v25 = vld [vmem:[%s4138_s1 + $0x124] sm:$0xf] }
  0x3c   :  { %690 = vmatpush.bf16.msrb.mxu0 %v2065_v14  ;;  %v2582_v14 = vld [vmem:[%s4138_s1 + $0x184] sm:$0xf]  ;;  %v2074_v18 = vld [vmem:[%s4138_s1 + $0x228] sm:$0xf0]  ;;  %v2600_v29 = vld [vmem:[%s4138_s1 + $0x214] sm:$0xf] }
  0x3d   :  { %783 = vmatpush.bf16.msra.mxu1 %v2021_v58  ;;  %v1946_v26 = vld [vmem:[%s4138_s1 + $0x128] sm:$0xf0]  ;;  %v2066_v30 = vld [vmem:[%s4138_s1 + $0x218] sm:$0xf0]  ;;  %v2568_v33 = vld [vmem:[%s4138_s1 + $0x114] sm:$0xf] }
  0x3e   :  { %728 = vmatpush.bf16.msrb.mxu2 %v1813_v2  ;;  %v1973_v2 = vor.u32 %v2576_v56, %v1970_v60  ;;  %v2069_v32 = vor.u32 %v2600_v29, %v2066_v30  ;;  %v1938_v34 = vld [vmem:[%s4138_s1 + $0x118] sm:$0xf0]  ;;  %v2058_v36 = vld [vmem:[%s4138_s1 + $0x208] sm:$0xf0]  ;;  %v2284_v45 = vld [vmem:[%s4140_s3 + $0x120] sm:$0xf] }
  0x3f   :  { %747 = vmatpush.bf16.msrb.mxu3 %v1877_v7  ;;  %v2604_v7 = vld [vmem:[%s4138_s1 + $0x234] sm:$0xf]  ;;  %v1941_v38 = vor.u32 %v2568_v33, %v1938_v34  ;;  %v1930_v41 = vld [vmem:[%s4138_s1 + $0x108] sm:$0xf0]  ;;  %v2286_v51 = vld [vmem:[%s4140_s3 + $0x138] sm:$0xf0] }
  0x40   :  { %691 = vmatpush.bf16.msrb.mxu0 %v2057_v31  ;;  %v2085_v12 = vor.u32 %v2604_v7, %v2082_v8  ;;  %v1949_v31 = vor.u32 %v2570_v25, %v1946_v26  ;;  %v2260_v58 = vld [vmem:[%s4140_s3 + $0xf0] sm:$0xf]  ;;  %v2648_v60 = vld [vmem:[%s4140_s3 + $0xf4] sm:$0xf]  ;;  %v2262_v62 = vld [vmem:[%s4140_s3 + $0x108] sm:$0xf0] }
  0x41   :  { %784 = vmatpush.bf16.msra.mxu1 %v2013_v4  ;;  %v2265_v63 = vor.u32 %v2648_v60, %v2262_v62  ;;  %v2236_v0 = vld [vmem:[%s4140_s3 + $0xc0] sm:$0xf]  ;;  %v2645_v1 = vld [vmem:[%s4140_s3 + $0xd4] sm:$0xf0]  ;;  %v2238_v4 = vld [vmem:[%s4140_s3 + $0xd8] sm:$0xf0] }
  0x42   :  { %729 = vmatpush.bf16.msrb.mxu2 %v1805_v17  ;;  %v2602_v17 = vld [vmem:[%s4138_s1 + $0x224] sm:$0xf]  ;;  %v2237_v3 = vor.u32 %v2645_v1, %v2236_v0  ;;  %v2212_v8 = vld [vmem:[%s4140_s3 + $0x90] sm:$0xf]  ;;  %v2633_v16 = vld [vmem:[%s4140_s3 + $0x74] sm:$0xf0] }
  0x43   :  { %748 = vmatpush.bf16.msrb.mxu3 %v1869_v22  ;;  %692 = vmatmul.bf16.vlgmr.msrb.gmra.mxu0 %v3239_v46  ;;  %v1957_v22 = vor.u32 %v2572_v10, %v1954_v13  ;;  %v2077_v24 = vor.u32 %v2602_v17, %v2074_v18  ;;  %v2636_v10 = vld [vmem:[%s4140_s3 + $0x94] sm:$0xf]  ;;  %v2630_v17 = vld [vmem:[%s4140_s3 + $0x64] sm:$0xf]  ;;  %v2190_v19 = vld [vmem:[%s4140_s3 + $0x78] sm:$0xf0] }
  0x44   :  { %760 = vmatpush.bf16.msra.mxu0 %v1989_v35  ;;  %2134 = vmatmul.msk.bf16.vlgmr.msrb.gmra.mxu1 %vm601_vm0, %v3241_v49  ;;  %v2598_v35 = vld [vmem:[%s4138_s1 + $0x204] sm:$0xf]  ;;  %v2164_v26 = vld [vmem:[%s4140_s3 + $0x30] sm:$0xf]  ;;  %v2166_v30 = vld [vmem:[%s4140_s3 + $0x48] sm:$0xf0] }
  0x45   :  { %730 = vmatmul.bf16.vlgmr.msrb.gmra.mxu2 %v2981_v48  ;;  %v2584_v48 = vld [vmem:[%s4138_s1 + $0x194] sm:$0xf]  ;;  %v2061_v39 = vor.u32 %v2598_v35, %v2058_v36  ;;  %v2140_v33 = vld [vmem:[%s4140_s3] sm:$0xf]  ;;  %v2621_v34 = vld [vmem:[%s4140_s3 + $0x14] sm:$0xf0] }
  0x46   :  { %798 = vmatpush.bf16.msra.mxu2 %v2117_v23  ;;  %749 = vmatmul.bf16.vlgmr.msrb.gmra.mxu3 %v2992_v53  ;;  %v2002_v53 = vld [vmem:[%s4138_s1 + $0x198] sm:$0xf0]  ;;  %v1997_v23 = vor.u32 %v2582_v14, %v1994_v15  ;;  %v3431_v14 = vld [vmem:[%s4141_s2] sm:$0x3]  ;;  %v2618_v35 = vld [vmem:[%s4140_s3 + $0x4] sm:$0xf]  ;;  %v2141_v36 = vor.u32 %v2621_v34, %v2140_v33 }
  0x47   :  { %823 = vmatpush.bf16.msra.mxu3 %v2133_v28  ;;  %v2005_v11 = vor.u32 %v2584_v48, %v2002_v53  ;;  %v1797_v28 = vor.u32 %v2530_v20, %v1794_v21  ;;  %v2188_v15 = vld [vmem:[%s4140_s3 + $0x60] sm:$0xf]  ;;  %v2193_v21 = vor.u32 %v2630_v17, %v2190_v19  ;;  %v2502_v62 = vld [vmem:[%s4140_s3 + $0x2e8] sm:$0xf0]  ;;  %v2696_v33 = vld [vmem:[%s4140_s3 + $0x274] sm:$0xf] }
  0x48   :  { %761 = vmatpush.bf16.msra.mxu0 %v1981_v55  ;;  %v2189_v18 = vor.u32 %v2633_v16, %v2188_v15  ;;  %v2702_v15 = vld [vmem:[%s4140_s3 + $0x2a4] sm:$0xf]  ;;  %v2478_v16 = vld [vmem:[%s4140_s3 + $0x2b8] sm:$0xf0]  ;;  %v2454_v34 = vld [vmem:[%s4140_s3 + $0x288] sm:$0xf0] }
  0x49   :  { %785 = vmatpush.bf16.msra.mxu1 %v2005_v11 }
  0x4a   :  { %799 = vmatpush.bf16.msra.mxu2 %v2109_v40  ;;  %v2566_v40 = vld [vmem:[%s4138_s1 + $0x104] sm:$0xf] }
  0x4b   :  { %824 = vmatpush.bf16.msra.mxu3 %v2125_v61  ;;  %v1933_v44 = vor.u32 %v2566_v40, %v1930_v41 }
  0x4c   :  { %762 = vmatpush.bf16.msra.mxu0 %v1973_v2  ;;  %v2642_v2 = vld [vmem:[%s4140_s3 + $0xc4] sm:$0xf] }
  0x4d   :  { %786 = vmatpush.bf16.msra.mxu1 %v1997_v23  ;;  %v2241_v6 = vor.u32 %v2642_v2, %v2238_v4 }
  0x4e   :  { %800 = vmatpush.bf16.msra.mxu2 %v2101_v59  ;;  %v2651_v59 = vld [vmem:[%s4140_s3 + $0x104] sm:$0xf0] }
  0x4f   :  { %v2261_v61 = vor.u32 %v2651_v59, %v2260_v58  ;;  %v2294_v58 = vld [vmem:[%s4140_s3 + $0x140] sm:$0xf0] }
  0x50   :  { %763 = vmatpush.bf16.msra.mxu0 %v1965_v9  ;;  %v2639_v9 = vld [vmem:[%s4140_s3 + $0xa4] sm:$0xf0] }
  0x51   :  { %v2213_v11 = vor.u32 %v2639_v9, %v2212_v8  ;;  %v2649_v8 = vld [vmem:[%s4140_s3 + $0xfc] sm:$0xf] }
  0x52   :  { %801 = vmatpush.bf16.msra.mxu2 %v2093_v5 }
  0x53   :  { %697 = vmatmul.bf16.gmra.mxu0 %v1793_v27 }
  0x54   :  { %764 = vmatpush.bf16.msra.mxu0 %v1957_v22  ;;  %2135 = vmatmul.msk.bf16.gmra.mxu1 %vm601_vm0, %v1797_v28  ;;  %v3448_v22 = vperm.slane %v3431_v14, 0 }
  0x55   :  { %735 = vmatmul.bf16.gmra.mxu2 %v3098_v37  ;;  %v2308_v37 = vld [vmem:[%s4140_s3 + $0x150] sm:$0xf] }
  0x56   :  { %802 = vmatpush.bf16.msra.mxu2 %v2085_v12  ;;  %754 = vmatmul.bf16.gmra.mxu3 %v3109_v42  ;;  %v2214_v12 = vld [vmem:[%s4140_s3 + $0xa8] sm:$0xf0] }
  0x57   :  { %v2217_v13 = vor.u32 %v2636_v10, %v2214_v12  ;;  %v2270_v12 = vld [vmem:[%s4140_s3 + $0x110] sm:$0xf0] }
  0x58   :  { %765 = vmatpush.bf16.msra.mxu0 %v1949_v31 }
  0x5a   :  { %803 = vmatpush.bf16.msra.mxu2 %v2077_v24 }
  0x5c   :  { %766 = vmatpush.bf16.msra.mxu0 %v1941_v38  ;;  %v2142_v38 = vld [vmem:[%s4140_s3 + $0x18] sm:$0xf0] }
  0x5d   :  { %v2145_v40 = vor.u32 %v2618_v35, %v2142_v38  ;;  %v2452_v35 = vld [vmem:[%s4140_s3 + $0x270] sm:$0xf] }
  0x5e   :  { %804 = vmatpush.bf16.msra.mxu2 %v2069_v32 }
  0x60   :  { %767 = vmatpush.bf16.msra.mxu0 %v1933_v44 }
  0x62   :  { %805 = vmatpush.bf16.msra.mxu2 %v2061_v39 }
  0x63   :  { %768 = vmatmul.bf16.vlgmr.msra.gmra.mxu0 %v2994_v54  ;;  %v2663_v54 = vld [vmem:[%s4140_s3 + $0x164] sm:$0xf0] }
  0x64   :  { %787 = vmatmul.bf16.vlgmr.msra.gmra.mxu1 %v3002_v57  ;;  %v2660_v57 = vld [vmem:[%s4140_s3 + $0x154] sm:$0xf]  ;;  %v2309_v42 = vor.u32 %v2663_v54, %v2308_v37 }
  0x65   :  { %806 = vmatmul.bf16.vlgmr.msra.gmra.mxu2 %v3239_v46  ;;  %v2657_v46 = vld [vmem:[%s4140_s3 + $0x134] sm:$0xf0] }
  0x66   :  { %2136 = vmatmul.msk.bf16.vlgmr.msra.gmra.mxu3 %vm601_vm0, %v3241_v49  ;;  %1470 = vmatpush.bf16.msrb.mxu0 %v2309_v42  ;;  %v2654_v49 = vld [vmem:[%s4140_s3 + $0x124] sm:$0xf]  ;;  %v2285_v50 = vor.u32 %v2657_v46, %v2284_v45  ;;  %v2664_v42 = vld [vmem:[%s4140_s3 + $0x16c] sm:$0xf0]  ;;  %v2318_v45 = vld [vmem:[%s4140_s3 + $0x170] sm:$0xf0] }
  0x67   :  { %v2289_v52 = vor.u32 %v2654_v49, %v2286_v51  ;;  %v2658_v51 = vld [vmem:[%s4140_s3 + $0x13c] sm:$0xf0] }
  0x6a   :  { %1471 = vmatpush.bf16.msrb.mxu0 %v2285_v50  ;;  %v2292_v50 = vld [vmem:[%s4140_s3 + $0x128] sm:$0xf] }
  0x6e   :  { %1472 = vmatpush.bf16.msrb.mxu0 %v2261_v61  ;;  %v2708_v61 = vld [vmem:[%s4140_s3 + $0x2d4] sm:$0xf] }
  0x6f   :  { %v2505_v2 = vor.u32 %v2708_v61, %v2502_v62 }
  0x71   :  { %1527 = vmatpush.bf16.msrb.mxu3 %v2505_v2  ;;  %v2693_v2 = vld [vmem:[%s4140_s3 + $0x254] sm:$0xf0] }
  0x72   :  { %1473 = vmatpush.bf16.msrb.mxu0 %v2237_v3  ;;  %v2711_v3 = vld [vmem:[%s4140_s3 + $0x2e4] sm:$0xf0] }
  0x73   :  { %773 = vmatmul.bf16.gmra.mxu0 %v3111_v43  ;;  %v2310_v43 = vld [vmem:[%s4140_s3 + $0x168] sm:$0xf0] }
  0x74   :  { %792 = vmatmul.bf16.gmra.mxu1 %v3122_v47  ;;  %v2313_v47 = vor.u32 %v2660_v57, %v2310_v43  ;;  %v2316_v57 = vld [vmem:[%s4140_s3 + $0x158] sm:$0xf]  ;;  %v2661_v43 = vld [vmem:[%s4140_s3 + $0x15c] sm:$0xf] }
  0x75   :  { %811 = vmatmul.bf16.gmra.mxu2 %v1793_v27  ;;  %v2627_v27 = vld [vmem:[%s4140_s3 + $0x44] sm:$0xf0]  ;;  %v2321_v46 = vor.u32 %v2661_v43, %v2318_v45 }
  0x76   :  { %2137 = vmatmul.msk.bf16.gmra.mxu3 %vm601_vm0, %v1797_v28  ;;  %1508 = vmatpush.bf16.msrb.mxu2 %v2313_v47  ;;  %v2624_v28 = vld [vmem:[%s4140_s3 + $0x34] sm:$0xf]  ;;  %v2165_v29 = vor.u32 %v2627_v27, %v2164_v26  ;;  %v2317_v47 = vor.u32 %v2664_v42, %v2316_v57  ;;  %v2705_v26 = vld [vmem:[%s4140_s3 + $0x2b4] sm:$0xf0]  ;;  %v2457_v42 = vor.u32 %v2696_v33, %v2454_v34  ;;  %v2699_v43 = vld [vmem:[%s4140_s3 + $0x284] sm:$0xf0] }
  0x77   :  { %1474 = vmatpush.bf16.msrb.mxu0 %v2213_v11  ;;  %v2169_v31 = vor.u32 %v2624_v28, %v2166_v30  ;;  %v2244_v28 = vld [vmem:[%s4140_s3 + $0xc8] sm:$0xf]  ;;  %v2382_v33 = vld [vmem:[%s4140_s3 + $0x1f8] sm:$0xf0]  ;;  %v2380_v34 = vld [vmem:[%s4140_s3 + $0x1e0] sm:$0xf] }
  0x7a   :  { %1509 = vmatpush.bf16.msrb.mxu2 %v2289_v52  ;;  %v2655_v52 = vld [vmem:[%s4140_s3 + $0x12c] sm:$0xf] }
  0x7b   :  { %1475 = vmatpush.bf16.msrb.mxu0 %v2189_v18  ;;  %v2297_v60 = vor.u32 %v2655_v52, %v2294_v58  ;;  %v2222_v52 = vld [vmem:[%s4140_s3 + $0xb0] sm:$0xf0]  ;;  %v2430_v58 = vld [vmem:[%s4140_s3 + $0x258] sm:$0xf0] }
  0x7e   :  { %1510 = vmatpush.bf16.msrb.mxu2 %v2265_v63  ;;  %v2500_v63 = vld [vmem:[%s4140_s3 + $0x2d0] sm:$0xf] }
  0x7f   :  { %1476 = vmatpush.bf16.msrb.mxu0 %v2165_v29 }
  0x82   :  { %1511 = vmatpush.bf16.msrb.mxu2 %v2241_v6  ;;  %v2501_v6 = vor.u32 %v2711_v3, %v2500_v63 }
  0x83   :  { %1477 = vmatpush.bf16.msrb.mxu0 %v2141_v36 }
  0x84   :  { %1489 = vmatpush.bf16.msrb.mxu1 %v2501_v6  ;;  %v2631_v6 = vld [vmem:[%s4140_s3 + $0x6c] sm:$0xf] }
  0x86   :  { %1512 = vmatpush.bf16.msrb.mxu2 %v2217_v13  ;;  %v2273_v13 = vor.u32 %v2649_v8, %v2270_v12  ;;  %v2684_v8 = vld [vmem:[%s4140_s3 + $0x214] sm:$0xf] }
  0x87   :  { %1546 = vmatpush.bf16.msra.mxu0 %v2317_v47 }
  0x8a   :  { %1513 = vmatpush.bf16.msrb.mxu2 %v2193_v21  ;;  %v2481_v21 = vor.u32 %v2702_v15, %v2478_v16 }
  0x8c   :  { %1528 = vmatpush.bf16.msrb.mxu3 %v2481_v21 }
  0x8e   :  { %1514 = vmatpush.bf16.msrb.mxu2 %v2169_v31  ;;  %v2246_v31 = vld [vmem:[%s4140_s3 + $0xe0] sm:$0xf0] }
  0x90   :  { %1529 = vmatpush.bf16.msrb.mxu3 %v2457_v42 }
  0x92   :  { %1515 = vmatpush.bf16.msrb.mxu2 %v2145_v40 }
  0x96   :  { %1584 = vmatpush.bf16.msra.mxu2 %v2321_v46  ;;  %v2453_v46 = vor.u32 %v2699_v43, %v2452_v35  ;;  %v2148_v43 = vld [vmem:[%s4140_s3 + $0x8] sm:$0xf] }
  0x9a   :  { %1585 = vmatpush.bf16.msra.mxu2 %v2297_v60  ;;  %v2428_v60 = vld [vmem:[%s4140_s3 + $0x240] sm:$0xf] }
  0x9e   :  { %1586 = vmatpush.bf16.msra.mxu2 %v2273_v13 }
  0xa0   :  { %v617_v55 = vpop.f32.mrf.mxu0 }
  0xa1   :  { %v636_v56 = vpop.f32.mrf.mxu1  ;;  %v618_v32 = vadd.f32 %v617_v55, %v3448_v22 }
  0xa3   :  { %v637_v41 = vadd.f32 %v636_v56, %v618_v32  ;;  %v2293_v56 = vor.u32 %v2658_v51, %v2292_v50 }
  0xa5   :  { %1547 = vmatpush.bf16.msra.mxu0 %v2293_v56  ;;  %v2690_v56 = vld [vmem:[%s4140_s3 + $0x244] sm:$0xf] }
  0xa8   :  { %v655_v5 = vpop.f32.mrf.mxu2  ;;  %v619_v53 = vpop.f32.mrf.mxu0 }
  0xa9   :  { %v3412_v48 = vpop.f32.mrf.mxu3  ;;  %v3414_v7 = vpop.f32.mrf.mxu1  ;;  %v656_v49 = vadd.f32 %v655_v5, %v637_v41  ;;  %v620_v55 = vadd.f32 %v619_v53, %v3448_v22  ;;  %v2268_v53 = vld [vmem:[%s4140_s3 + $0xf8] sm:$0xf] }
  0xab   :  { %v675_v0 = vadd.f32 %v3412_v48, %v656_v49  ;;  %v2652_v48 = vld [vmem:[%s4140_s3 + $0x10c] sm:$0xf0]  ;;  %v639_v9 = vadd.f32 %v3414_v7, %v620_v55  ;;  %v2476_v7 = vld [vmem:[%s4140_s3 + $0x2a0] sm:$0xf]  ;;  %v2637_v49 = vld [vmem:[%s4140_s3 + $0x9c] sm:$0xf] }
  0xac   :  { %v2269_v11 = vor.u32 %v2652_v48, %v2268_v53  ;;  %v2477_v27 = vor.u32 %v2705_v26, %v2476_v7  ;;  %v2225_v55 = vor.u32 %v2637_v49, %v2222_v52  ;;  %v2150_v49 = vld [vmem:[%s4140_s3 + $0x20] sm:$0xf0]  ;;  %v2358_v52 = vld [vmem:[%s4140_s3 + $0x1c8] sm:$0xf0] }
  0xae   :  { %1548 = vmatpush.bf16.msra.mxu0 %v2269_v11  ;;  %1490 = vmatpush.bf16.msrb.mxu1 %v2477_v27 }
  0xb0   :  { %v3445_v20 = vpop.f32.mrf.mxu2  ;;  %v3452_v24 = vpop.f32.mrf.mxu0 }
  0xb1   :  { %v3450_v23 = vpop.f32.mrf.mxu3  ;;  %v3454_v25 = vpop.f32.mrf.mxu1  ;;  %v658_v17 = vadd.f32 %v3445_v20, %v639_v9  ;;  %v623_v18 = vadd.f32 %v3452_v24, %v3448_v22  ;;  %v2646_v20 = vld [vmem:[%s4140_s3 + $0xdc] sm:$0xf0]  ;;  %v2643_v24 = vld [vmem:[%s4140_s3 + $0xcc] sm:$0xf] }
  0xb2   :  { %v2245_v30 = vor.u32 %v2646_v20, %v2244_v28  ;;  %v2249_v32 = vor.u32 %v2643_v24, %v2246_v31  ;;  %1491 = vmatpush.bf16.msrb.mxu1 %v2453_v46  ;;  %v2406_v9 = vld [vmem:[%s4140_s3 + $0x228] sm:$0xf0]  ;;  %v2625_v28 = vld [vmem:[%s4140_s3 + $0x3c] sm:$0xf] }
  0xb3   :  { %v677_v36 = vadd.f32 %v3450_v23, %v658_v17  ;;  %v642_v38 = vadd.f32 %v3454_v25, %v623_v18  ;;  %v2220_v23 = vld [vmem:[%s4140_s3 + $0x98] sm:$0xf]  ;;  %v2640_v25 = vld [vmem:[%s4140_s3 + $0xac] sm:$0xf0]  ;;  %v2409_v7 = vor.u32 %v2684_v8, %v2406_v9  ;;  %v2687_v17 = vld [vmem:[%s4140_s3 + $0x224] sm:$0xf0] }
  0xb4   :  { %1549 = vmatpush.bf16.msra.mxu0 %v2245_v30  ;;  %1587 = vmatpush.bf16.msra.mxu2 %v2249_v32  ;;  %v2221_v51 = vor.u32 %v2640_v25, %v2220_v23  ;;  %v2678_v32 = vld [vmem:[%s4140_s3 + $0x1e4] sm:$0xf]  ;;  %v2334_v8 = vld [vmem:[%s4140_s3 + $0x198] sm:$0xf0]  ;;  %v2332_v9 = vld [vmem:[%s4140_s3 + $0x180] sm:$0xf] }
  0xb8   :  { %v3481_v39 = vpop.f32.mrf.mxu2  ;;  %v3485_v37 = vpop.f32.mrf.mxu0  ;;  %1550 = vmatpush.bf16.msra.mxu0 %v2221_v51  ;;  %1588 = vmatpush.bf16.msra.mxu2 %v2225_v55  ;;  %v2672_v51 = vld [vmem:[%s4140_s3 + $0x1b4] sm:$0xf]  ;;  %v2356_v55 = vld [vmem:[%s4140_s3 + $0x1b0] sm:$0xf] }
  0xb9   :  { %v3483_v44 = vpop.f32.mrf.mxu3  ;;  %v3487_v54 = vpop.f32.mrf.mxu1  ;;  %v661_v61 = vadd.f32 %v3481_v39, %v642_v38  ;;  %v625_v3 = vadd.f32 %v3485_v37, %v3448_v22  ;;  %v2634_v39 = vld [vmem:[%s4140_s3 + $0x7c] sm:$0xf0]  ;;  %v2198_v22 = vld [vmem:[%s4140_s3 + $0x80] sm:$0xf0] }
  0xba   :  { %v2201_v37 = vor.u32 %v2631_v6, %v2198_v22 }
  0xbb   :  { %v680_v11 = vadd.f32 %v3483_v44, %v661_v61  ;;  %v644_v18 = vadd.f32 %v3487_v54, %v625_v3  ;;  %v2172_v44 = vld [vmem:[%s4140_s3 + $0x38] sm:$0xf] }
  0xbc   :  { %1589 = vmatpush.bf16.msra.mxu2 %v2201_v37  ;;  %v2666_v37 = vld [vmem:[%s4140_s3 + $0x184] sm:$0xf] }
  0xc0   :  { %v3514_v59 = vpop.f32.mrf.mxu2  ;;  %v693_v4 = vpop.f32.mrf.mxu0 }
  0xc1   :  { %v3526_v1 = vpop.f32.mrf.mxu3  ;;  %v712_v5 = vpop.f32.mrf.mxu1  ;;  %v694_v10 = vadd.f32 %v693_v4, %v675_v0  ;;  %v2433_v0 = vor.u32 %v2690_v56, %v2430_v58  ;;  %v2429_v4 = vor.u32 %v2693_v2, %v2428_v60  ;;  %v663_v30 = vadd.f32 %v3514_v59, %v644_v18  ;;  %v2659_v18 = vld [vmem:[%s4140_s3 + $0x144] sm:$0xf0] }
  0xc2   :  { %v2385_v59 = vor.u32 %v2678_v32, %v2382_v33  ;;  %v3701_v58 = vperm.slane %v3431_v14, 1  ;;  %v2324_v14 = vld [vmem:[%s4140_s3 + $0x160] sm:$0xf]  ;;  %v2712_v32 = vld [vmem:[%s4140_s3 + $0x2ec] sm:$0xf0] }
  0xc3   :  { %v3556_v19 = vadd.f32 %v712_v5, %v694_v10  ;;  %v2196_v5 = vld [vmem:[%s4140_s3 + $0x68] sm:$0xf]  ;;  %1530 = vmatpush.bf16.msrb.mxu3 %v2433_v0  ;;  %1492 = vmatpush.bf16.msrb.mxu1 %v2429_v4  ;;  %v2404_v10 = vld [vmem:[%s4140_s3 + $0x210] sm:$0xf]  ;;  %v682_v56 = vadd.f32 %v3526_v1, %v663_v30  ;;  %v2665_v1 = vld [vmem:[%s4140_s3 + $0x174] sm:$0xf0] }
  0xc4   :  { %v2197_v48 = vor.u32 %v2634_v39, %v2196_v5  ;;  %v2405_v27 = vor.u32 %v2687_v17, %v2404_v10  ;;  %v2675_v0 = vld [vmem:[%s4140_s3 + $0x1c4] sm:$0xf0]  ;;  %v2662_v5 = vld [vmem:[%s4140_s3 + $0x164] sm:$0xf]  ;;  %v2300_v17 = vld [vmem:[%s4140_s3 + $0x130] sm:$0xf] }
  0xc5   :  { %v836_v29 = vadd.f32 3.0, %v3556_v19  ;;  %v2357_v4 = vor.u32 %v2675_v0, %v2356_v55  ;;  %v2647_v0 = vld [vmem:[%s4140_s3 + $0xe4] sm:$0xf0] }
  0xc6   :  { %1551 = vmatpush.bf16.msra.mxu0 %v2197_v48  ;;  %v2326_v48 = vld [vmem:[%s4140_s3 + $0x178] sm:$0xf0] }
  0xc7   :  { %v844_v40 = vmax.f32 %v836_v29, 0.0  ;;  %1531 = vmatpush.bf16.msrb.mxu3 %v2409_v7  ;;  %v2174_v29 = vld [vmem:[%s4140_s3 + $0x50] sm:$0xf0]  ;;  %1493 = vmatpush.bf16.msrb.mxu1 %v2405_v27  ;;  %v2329_v22 = vor.u32 %v2662_v5, %v2326_v48 }
  0xc8   :  { %v3585_v41 = vpop.f32.mrf.mxu2  ;;  %v695_v47 = vpop.f32.mrf.mxu0  ;;  %v2177_v31 = vor.u32 %v2625_v28, %v2174_v29  ;;  %v2709_v28 = vld [vmem:[%s4140_s3 + $0x2dc] sm:$0xf] }
  0xc9   :  { %v3587_v57 = vpop.f32.mrf.mxu3  ;;  %v714_v45 = vpop.f32.mrf.mxu1  ;;  %v696_v50 = vadd.f32 %v695_v47, %v677_v36  ;;  %v852_v62 = vmin.f32 %v844_v40, 6.0  ;;  %v2681_v40 = vld [vmem:[%s4140_s3 + $0x1f4] sm:$0xf0]  ;;  %v2622_v47 = vld [vmem:[%s4140_s3 + $0x1c] sm:$0xf0] }
  0xca   :  { %1590 = vmatpush.bf16.msra.mxu2 %v2177_v31  ;;  %v2381_v42 = vor.u32 %v2681_v40, %v2380_v34  ;;  %v2149_v25 = vor.u32 %v2622_v47, %v2148_v43  ;;  %v2653_v40 = vld [vmem:[%s4140_s3 + $0x114] sm:$0xf0] }
  0xcb   :  { %v715_v63 = vadd.f32 %v714_v45, %v696_v50  ;;  %v860_v12 = vmul.f32 %v852_v62, %v3556_v19  ;;  %v2628_v19 = vld [vmem:[%s4140_s3 + $0x4c] sm:$0xf0]  ;;  %v2619_v45 = vld [vmem:[%s4140_s3 + $0xc] sm:$0xf]  ;;  %1532 = vmatpush.bf16.msrb.mxu3 %v2385_v59  ;;  %v2276_v59 = vld [vmem:[%s4140_s3 + $0x100] sm:$0xf] }
  0xcc   :  { %v2173_v54 = vor.u32 %v2628_v19, %v2172_v44  ;;  %1494 = vmatpush.bf16.msrb.mxu1 %v2381_v42  ;;  %v2153_v50 = vor.u32 %v2619_v45, %v2150_v49  ;;  %v2301_v44 = vor.u32 %v2659_v18, %v2300_v17  ;;  %v2650_v42 = vld [vmem:[%s4140_s3 + $0x104] sm:$0xf]  ;;  %v2278_v45 = vld [vmem:[%s4140_s3 + $0x118] sm:$0xf0]  ;;  %v2641_v17 = vld [vmem:[%s4140_s3 + $0xb4] sm:$0xf0] }
  0xcd   :  { %v838_v53 = vadd.f32 3.0, %v715_v63  ;;  %v868_v35 = vmul.f32 0.16666667, %v860_v12  ;;  %v2669_v12 = vld [vmem:[%s4140_s3 + $0x194] sm:$0xf0] }
  0xce   :  { %1552 = vmatpush.bf16.msra.mxu0 %v2173_v54  ;;  %1591 = vmatpush.bf16.msra.mxu2 %v2153_v50  ;;  %v2333_v7 = vor.u32 %v2669_v12, %v2332_v9  ;;  %v2486_v49 = vld [vmem:[%s4140_s3 + $0x2c0] sm:$0xf0]  ;;  %v2700_v9 = vld [vmem:[%s4140_s3 + $0x28c] sm:$0xf0] }
  0xcf   :  { %v846_v13 = vmax.f32 %v838_v53, 0.0  ;;  %v2325_v53 = vor.u32 %v2665_v1, %v2324_v14  ;;  %v2638_v18 = vld [vmem:[%s4140_s3 + $0xa4] sm:$0xf] }
  0xd0   :  { %v3642_v15 = vpop.f32.mrf.mxu2  ;;  %v698_v21 = vpop.f32.mrf.mxu0  ;;  %1495 = vmatpush.bf16.msrb.mxu1 %v2357_v4 }
  0xd1   :  { %v3644_v16 = vpop.f32.mrf.mxu3  ;;  %v717_v26 = vpop.f32.mrf.mxu1  ;;  %v854_v20 = vmin.f32 %v846_v13, 6.0  ;;  %v699_v24 = vadd.f32 %v698_v21, %v680_v11  ;;  %v2337_v11 = vor.u32 %v2666_v37, %v2334_v8  ;;  %v732_v13 = vadd.f32 %v3585_v41, %v3701_v58  ;;  %v2656_v21 = vld [vmem:[%s4140_s3 + $0x134] sm:$0xf]  ;;  %v2302_v41 = vld [vmem:[%s4140_s3 + $0x148] sm:$0xf0] }
  0xd2   :  { %1553 = vmatpush.bf16.msra.mxu0 %v2149_v25  ;;  %v2305_v19 = vor.u32 %v2656_v21, %v2302_v41  ;;  %v2703_v25 = vld [vmem:[%s4140_s3 + $0x2ac] sm:$0xf]  ;;  %v734_v55 = vadd.f32 %v3642_v15, %v3701_v58 }
  0xd3   :  { %v862_v36 = vmul.f32 %v854_v20, %v715_v63  ;;  %v3672_v38 = vadd.f32 %v717_v26, %v699_v24  ;;  %v2361_v63 = vor.u32 %v2672_v51, %v2358_v52  ;;  %v2510_v20 = vld [vmem:[%s4140_s3 + $0x2f0] sm:$0xf0]  ;;  %v2508_v24 = vld [vmem:[%s4140_s3 + $0x2d8] sm:$0xf]  ;;  %v751_v33 = vadd.f32 %v3587_v57, %v732_v13  ;;  %v2706_v52 = vld [vmem:[%s4140_s3 + $0x2bc] sm:$0xf0] }
  0xd4   :  { %1496 = vmatpush.bf16.msrb.mxu1 %v2333_v7  ;;  %v2513_v31 = vor.u32 %v2709_v28, %v2510_v20  ;;  %v2277_v57 = vor.u32 %v2653_v40, %v2276_v59  ;;  %v2489_v51 = vor.u32 %v2703_v25, %v2486_v49  ;;  %v2254_v15 = vld [vmem:[%s4140_s3 + $0xe8] sm:$0xf0]  ;;  %v2228_v7 = vld [vmem:[%s4140_s3 + $0xa0] sm:$0xf]  ;;  %v2438_v28 = vld [vmem:[%s4140_s3 + $0x260] sm:$0xf0] }
  0xd5   :  { %v870_v46 = vmul.f32 0.16666667, %v862_v36  ;;  %v840_v23 = vadd.f32 3.0, %v3672_v38  ;;  %1533 = vmatpush.bf16.msrb.mxu3 %v2361_v63  ;;  %v2509_v36 = vor.u32 %v2712_v32, %v2508_v24  ;;  %v2252_v63 = vld [vmem:[%s4140_s3 + $0xd0] sm:$0xf] }
  0xd6   :  { %v2253_v14 = vor.u32 %v2647_v0, %v2252_v63  ;;  %v2436_v20 = vld [vmem:[%s4140_s3 + $0x248] sm:$0xf]  ;;  %v2632_v59 = vld [vmem:[%s4140_s3 + $0x74] sm:$0xf]  ;;  %v2688_v25 = vld [vmem:[%s4140_s3 + $0x22c] sm:$0xf0] }
  0xd7   :  { %v3703_v60 = vpack.c.bf16 %v870_v46, %v868_v35  ;;  %v848_v39 = vmax.f32 %v840_v23, 0.0  ;;  %v2281_v23 = vor.u32 %v2650_v42, %v2278_v45  ;;  %v2626_v0 = vld [vmem:[%s4140_s3 + $0x44] sm:$0xf] }
  0xd8   :  { %v3705_v61 = vpop.f32.mrf.mxu2  ;;  %v700_v2 = vpop.f32.mrf.mxu0  ;;  %1565 = vmatpush.bf16.msra.mxu1 %v2509_v36 }
  0xd9   :  { %v3707_v62 = vpop.f32.mrf.mxu3  ;;  %v719_v3 = vpop.f32.mrf.mxu1  ;;  %v701_v6 = vadd.f32 %v700_v2, %v682_v56  ;;  %1478 = vmatmul.bf16.vlgmr.msrb.gmra.mxu0 %v3703_v60  ;;  %1516 = vmatmul.bf16.vlgmr.msrb.gmra.mxu2 %v3703_v60  ;;  %v856_v26 = vmin.f32 %v848_v39, 6.0  ;;  %v2644_v2 = vld [vmem:[%s4140_s3 + $0xd4] sm:$0xf]  ;;  %v2697_v39 = vld [vmem:[%s4140_s3 + $0x27c] sm:$0xf] }
  0xda   :  { %1622 = vmatpush.bf16.msrb.mxu0 %v2325_v53  ;;  %1660 = vmatpush.bf16.msrb.mxu2 %v2329_v22  ;;  %v2257_v5 = vor.u32 %v2644_v2, %v2254_v15  ;;  %v2460_v53 = vld [vmem:[%s4140_s3 + $0x278] sm:$0xf]  ;;  %v2679_v2 = vld [vmem:[%s4140_s3 + $0x1ec] sm:$0xf]  ;;  %v2390_v15 = vld [vmem:[%s4140_s3 + $0x200] sm:$0xf0] }
  0xdb   :  { %v720_v10 = vadd.f32 %v719_v3, %v701_v6  ;;  %1534 = vmatpush.bf16.msrb.mxu3 %v2337_v11  ;;  %v864_v43 = vmul.f32 %v856_v26, %v3672_v38  ;;  %v2484_v38 = vld [vmem:[%s4140_s3 + $0x2a8] sm:$0xf]  ;;  %v2462_v6 = vld [vmem:[%s4140_s3 + $0x290] sm:$0xf0]  ;;  %v2461_v13 = vor.u32 %v2700_v9, %v2460_v53  ;;  %v2230_v26 = vld [vmem:[%s4140_s3 + $0xb8] sm:$0xf0]  ;;  %v2393_v53 = vor.u32 %v2679_v2, %v2390_v15 }
  0xdc   :  { %v2485_v56 = vor.u32 %v2706_v52, %v2484_v38  ;;  %v2465_v8 = vor.u32 %v2697_v39, %v2462_v6  ;;  %v2233_v41 = vor.u32 %v2638_v18, %v2230_v26  ;;  %v2620_v9 = vld [vmem:[%s4140_s3 + $0x14] sm:$0xf]  ;;  %v2676_v26 = vld [vmem:[%s4140_s3 + $0x1cc] sm:$0xf0]  ;;  %v2698_v15 = vld [vmem:[%s4140_s3 + $0x284] sm:$0xf] }
  0xdd   :  { %v842_v27 = vadd.f32 3.0, %v720_v10  ;;  %v872_v3 = vmul.f32 0.16666667, %v864_v43  ;;  %v2685_v43 = vld [vmem:[%s4140_s3 + $0x21c] sm:$0xf] }
  0xde   :  { %1623 = vmatpush.bf16.msrb.mxu0 %v2301_v44  ;;  %1661 = vmatpush.bf16.msrb.mxu2 %v2305_v19  ;;  %v2691_v19 = vld [vmem:[%s4140_s3 + $0x24c] sm:$0xf]  ;;  %v2492_v2 = vld [vmem:[%s4140_s3 + $0x2b0] sm:$0xf] }
  0xdf   :  { %v850_v54 = vmax.f32 %v842_v27, 0.0  ;;  %1603 = vmatpush.bf16.msra.mxu3 %v2513_v31  ;;  %1566 = vmatpush.bf16.msra.mxu1 %v2485_v56  ;;  %v2441_v24 = vor.u32 %v2691_v19, %v2438_v28  ;;  %v737_v31 = vadd.f32 %v3705_v61, %v3701_v58  ;;  %v2206_v61 = vld [vmem:[%s4140_s3 + $0x88] sm:$0xf0]  ;;  %v2629_v56 = vld [vmem:[%s4140_s3 + $0x54] sm:$0xf0] }
  0xe0   :  { %v3761_v29 = vpop.f32.mrf.mxu2  ;;  %v769_v34 = vpop.f32.mrf.mxu0  ;;  %v2209_v42 = vor.u32 %v2632_v59, %v2206_v61  ;;  %v2670_v59 = vld [vmem:[%s4140_s3 + $0x19c] sm:$0xf0] }
  0xe1   :  { %v3763_v30 = vpop.f32.mrf.mxu3  ;;  %v788_v35 = vpop.f32.mrf.mxu1  ;;  %v858_v47 = vmin.f32 %v850_v54, 6.0  ;;  %v770_v46 = vadd.f32 %v769_v34, %v751_v33  ;;  %v2694_v54 = vld [vmem:[%s4140_s3 + $0x25c] sm:$0xf0]  ;;  %v2204_v34 = vld [vmem:[%s4140_s3 + $0x70] sm:$0xf]  ;;  %v756_v49 = vadd.f32 %v3707_v62, %v737_v31  ;;  %v739_v39 = vadd.f32 %v3761_v29, %v3701_v58 }
  0xe2   :  { %1624 = vmatpush.bf16.msrb.mxu0 %v2277_v57  ;;  %1662 = vmatpush.bf16.msrb.mxu2 %v2281_v23  ;;  %v2437_v33 = vor.u32 %v2694_v54, %v2436_v20  ;;  %v2412_v23 = vld [vmem:[%s4140_s3 + $0x218] sm:$0xf]  ;;  %v2182_v62 = vld [vmem:[%s4140_s3 + $0x58] sm:$0xf0]  ;;  %v2158_v29 = vld [vmem:[%s4140_s3 + $0x28] sm:$0xf0] }
  0xe3   :  { %v866_v50 = vmul.f32 %v858_v47, %v720_v10  ;;  %1604 = vmatpush.bf16.msra.mxu3 %v2489_v51  ;;  %v789_v1 = vadd.f32 %v788_v35, %v770_v46  ;;  %v753_v10 = vadd.f32 %v3644_v16, %v734_v55  ;;  %v2229_v16 = vor.u32 %v2641_v17, %v2228_v7  ;;  %v2635_v35 = vld [vmem:[%s4140_s3 + $0x84] sm:$0xf0]  ;;  %v2414_v47 = vld [vmem:[%s4140_s3 + $0x230] sm:$0xf0]  ;;  %v2180_v55 = vld [vmem:[%s4140_s3 + $0x40] sm:$0xf] }
  0xe4   :  { %1567 = vmatpush.bf16.msra.mxu1 %v2461_v13  ;;  %v2205_v36 = vor.u32 %v2635_v35, %v2204_v34  ;;  %v2417_v46 = vor.u32 %v2685_v43, %v2414_v47  ;;  %v2413_v52 = vor.u32 %v2688_v25, %v2412_v23  ;;  %v2181_v63 = vor.u32 %v2629_v56, %v2180_v55  ;;  %v2673_v13 = vld [vmem:[%s4140_s3 + $0x1bc] sm:$0xf]  ;;  %v2366_v7 = vld [vmem:[%s4140_s3 + $0x1d0] sm:$0xf0]  ;;  %v2364_v17 = vld [vmem:[%s4140_s3 + $0x1b8] sm:$0xf] }
  0xe5   :  { %v874_v4 = vmul.f32 0.16666667, %v866_v50  ;;  %v2365_v28 = vor.u32 %v2676_v26, %v2364_v17  ;;  %v2518_v23 = vld [vmem:[%s4140_s3 + $0x2f8] sm:$0xf0]  ;;  %v2704_v56 = vld [vmem:[%s4140_s3 + $0x2b4] sm:$0xf] }
  0xe6   :  { %1625 = vmatpush.bf16.msrb.mxu0 %v2253_v14  ;;  %1663 = vmatpush.bf16.msrb.mxu2 %v2257_v5  ;;  %v2185_v14 = vor.u32 %v2626_v0, %v2182_v62  ;;  %v2682_v5 = vld [vmem:[%s4140_s3 + $0x1fc] sm:$0xf0]  ;;  %v2686_v26 = vld [vmem:[%s4140_s3 + $0x224] sm:$0xf] }
  0xe7   :  { %v3817_v48 = vpack.c.bf16 %v874_v4, %v872_v3  ;;  %1605 = vmatpush.bf16.msra.mxu3 %v2465_v8  ;;  %v2623_v8 = vld [vmem:[%s4140_s3 + $0x24] sm:$0xf0] }
  0xe8   :  { %v807_v22 = vpop.f32.mrf.mxu2  ;;  %v771_v12 = vpop.f32.mrf.mxu0  ;;  %1568 = vmatpush.bf16.msra.mxu1 %v2437_v33  ;;  %v2667_v33 = vld [vmem:[%s4140_s3 + $0x18c] sm:$0xf] }
  0xe9   :  { %v826_v37 = vpop.f32.mrf.mxu3  ;;  %v808_v11 = vadd.f32 %v807_v22, %v789_v1  ;;  %v790_v21 = vpop.f32.mrf.mxu1  ;;  %1483 = vmatmul.bf16.gmra.mxu0 %v3817_v48  ;;  %1521 = vmatmul.bf16.gmra.mxu2 %v3817_v48  ;;  %v772_v44 = vadd.f32 %v771_v12, %v753_v10  ;;  %v2388_v1 = vld [vmem:[%s4140_s3 + $0x1e8] sm:$0xf]  ;;  %v2161_v12 = vor.u32 %v2620_v9, %v2158_v29  ;;  %v2444_v29 = vld [vmem:[%s4140_s3 + $0x250] sm:$0xf] }
  0xea   :  { %1626 = vmatpush.bf16.msrb.mxu0 %v2229_v16  ;;  %1664 = vmatpush.bf16.msrb.mxu2 %v2233_v41  ;;  %v2389_v22 = vor.u32 %v2682_v5, %v2388_v1  ;;  %v2369_v16 = vor.u32 %v2673_v13, %v2366_v7  ;;  %v2470_v1 = vld [vmem:[%s4140_s3 + $0x298] sm:$0xf0]  ;;  %v2468_v5 = vld [vmem:[%s4140_s3 + $0x280] sm:$0xf]  ;;  %v2695_v7 = vld [vmem:[%s4140_s3 + $0x264] sm:$0xf0] }
  0xeb   :  { %v3837_v27 = vadd.f32 %v826_v37, %v808_v11  ;;  %v791_v40 = vadd.f32 %v790_v21, %v772_v44  ;;  %1606 = vmatpush.bf16.msra.mxu3 %v2441_v24  ;;  %v2156_v37 = vld [vmem:[%s4140_s3 + $0x10] sm:$0xf]  ;;  %v758_v44 = vadd.f32 %v3763_v30, %v739_v39  ;;  %v2342_v30 = vld [vmem:[%s4140_s3 + $0x1a0] sm:$0xf0]  ;;  %v2701_v39 = vld [vmem:[%s4140_s3 + $0x294] sm:$0xf0]  ;;  %v2445_v17 = vor.u32 %v2695_v7, %v2444_v29 }
  0xec   :  { %1569 = vmatpush.bf16.msra.mxu1 %v2413_v52  ;;  %v2157_v58 = vor.u32 %v2623_v8, %v2156_v37  ;;  %v2473_v37 = vor.u32 %v2698_v15, %v2470_v1  ;;  %v2469_v8 = vor.u32 %v2701_v39, %v2468_v5 }
  0xed   :  { %v837_v32 = vadd.f32 3.0, %v3837_v27 }
  0xee   :  { %1627 = vmatpush.bf16.msrb.mxu0 %v2205_v36  ;;  %1665 = vmatpush.bf16.msrb.mxu2 %v2209_v42  ;;  %v2345_v36 = vor.u32 %v2667_v33, %v2342_v30 }
  0xef   :  { %v845_v38 = vmax.f32 %v837_v32, 0.0  ;;  %1607 = vmatpush.bf16.msra.mxu3 %v2417_v46  ;;  %v2710_v46 = vld [vmem:[%s4140_s3 + $0x2e4] sm:$0xf] }
  0xf0   :  { %v809_v57 = vpop.f32.mrf.mxu2  ;;  %v774_v51 = vpop.f32.mrf.mxu0  ;;  %1570 = vmatpush.bf16.msra.mxu1 %v2389_v22 }
  0xf1   :  { %v828_v45 = vpop.f32.mrf.mxu3  ;;  %v810_v50 = vadd.f32 %v809_v57, %v791_v40  ;;  %v775_v4 = vadd.f32 %v774_v51, %v756_v49  ;;  %v793_v6 = vpop.f32.mrf.mxu1  ;;  %v853_v10 = vmin.f32 %v845_v38, 6.0  ;;  %v2521_v49 = vor.u32 %v2710_v46, %v2518_v23  ;;  %v2516_v38 = vld [vmem:[%s4140_s3 + $0x2e0] sm:$0xf] }
  0xf2   :  { %1628 = vmatpush.bf16.msrb.mxu0 %v2181_v63  ;;  %1666 = vmatpush.bf16.msrb.mxu2 %v2185_v14  ;;  %v2494_v63 = vld [vmem:[%s4140_s3 + $0x2c8] sm:$0xf0] }
  0xf3   :  { %v829_v3 = vadd.f32 %v828_v45, %v810_v50  ;;  %v794_v21 = vadd.f32 %v793_v6, %v775_v4  ;;  %1608 = vmatpush.bf16.msra.mxu3 %v2393_v53  ;;  %v861_v20 = vmul.f32 %v853_v10, %v3837_v27  ;;  %v2340_v27 = vld [vmem:[%s4140_s3 + $0x188] sm:$0xf]  ;;  %v2713_v50 = vld [vmem:[%s4140_s3 + $0x2f4] sm:$0xf0]  ;;  %v2497_v62 = vor.u32 %v2704_v56, %v2494_v63 }
  0xf4   :  { %1571 = vmatpush.bf16.msra.mxu1 %v2365_v28  ;;  %v2341_v61 = vor.u32 %v2670_v59, %v2340_v27  ;;  %v2517_v55 = vor.u32 %v2713_v50, %v2516_v38  ;;  %v2689_v28 = vld [vmem:[%s4140_s3 + $0x234] sm:$0xf0]  ;;  %v2674_v27 = vld [vmem:[%s4140_s3 + $0x1c4] sm:$0xf] }
  0xf5   :  { %v839_v11 = vadd.f32 3.0, %v829_v3  ;;  %v869_v40 = vmul.f32 0.16666667, %v861_v20  ;;  %v4058_v38 = vld [vmem:[%s4142_s4] sm:$0x3f] }
  0xf6   :  { %1629 = vmatpush.bf16.msrb.mxu0 %v2157_v58  ;;  %1667 = vmatpush.bf16.msrb.mxu2 %v2161_v12  ;;  %v2446_v58 = vld [vmem:[%s4140_s3 + $0x268] sm:$0xf0]  ;;  %v979_v56 = vperm.slane %v4058_v38, 1 }
  0xf7   :  { %v847_v18 = vmax.f32 %v839_v11, 0.0  ;;  %1609 = vmatpush.bf16.msra.mxu3 %v2369_v16  ;;  %v2692_v11 = vld [vmem:[%s4140_s3 + $0x254] sm:$0xf] }
  0xf8   :  { %v812_v41 = vpop.f32.mrf.mxu2  ;;  %v776_v31 = vpop.f32.mrf.mxu0  ;;  %1572 = vmatpush.bf16.msra.mxu1 %v2341_v61  ;;  %v2449_v13 = vor.u32 %v2692_v11, %v2446_v58 }
  0xf9   :  { %v831_v19 = vpop.f32.mrf.mxu3  ;;  %v855_v24 = vmin.f32 %v847_v18, 6.0  ;;  %v813_v54 = vadd.f32 %v812_v41, %v794_v21  ;;  %v777_v32 = vadd.f32 %v776_v31, %v758_v44  ;;  %1554 = vmatmul.bf16.vlgmr.msra.gmra.mxu0 %v3703_v60  ;;  %1592 = vmatmul.bf16.vlgmr.msra.gmra.mxu2 %v3703_v60  ;;  %v795_v47 = vpop.f32.mrf.mxu1  ;;  %v2422_v44 = vld [vmem:[%s4140_s3 + $0x238] sm:$0xf0]  ;;  %v2420_v41 = vld [vmem:[%s4140_s3 + $0x220] sm:$0xf] }
  0xfa   :  { %v2421_v20 = vor.u32 %v2689_v28, %v2420_v41  ;;  %v2396_v31 = vld [vmem:[%s4140_s3 + $0x1f0] sm:$0xf] }
  0xfb   :  { %v863_v34 = vmul.f32 %v855_v24, %v829_v3  ;;  %v832_v35 = vadd.f32 %v831_v19, %v813_v54  ;;  %v796_v45 = vadd.f32 %v795_v47, %v777_v32  ;;  %1610 = vmatpush.bf16.msra.mxu3 %v2345_v36  ;;  %v2707_v3 = vld [vmem:[%s4140_s3 + $0x2c4] sm:$0xf0]  ;;  %v2425_v19 = vor.u32 %v2686_v26, %v2422_v44  ;;  %v2680_v24 = vld [vmem:[%s4140_s3 + $0x1f4] sm:$0xf]  ;;  %v2398_v54 = vld [vmem:[%s4140_s3 + $0x208] sm:$0xf0] }
  0xfc   :  { %v2493_v14 = vor.u32 %v2707_v3, %v2492_v2  ;;  %v2683_v32 = vld [vmem:[%s4140_s3 + $0x204] sm:$0xf0]  ;;  %v2401_v33 = vor.u32 %v2680_v24, %v2398_v54  ;;  %v2677_v36 = vld [vmem:[%s4140_s3 + $0x1d4] sm:$0xf0]  ;;  %v980_v44 = vperm.slane %v4058_v38, 2 }
  0xfd   :  { %v871_v42 = vmul.f32 0.16666667, %v863_v34  ;;  %v841_v43 = vadd.f32 3.0, %v832_v35  ;;  %v2397_v30 = vor.u32 %v2683_v32, %v2396_v31  ;;  %v2374_v34 = vld [vmem:[%s4140_s3 + $0x1d8] sm:$0xf0]  ;;  %v981_v32 = vperm.slane %v4058_v38, 3 }
  0xfe   :  { %v2377_v59 = vor.u32 %v2674_v27, %v2374_v34  ;;  %v2671_v47 = vld [vmem:[%s4140_s3 + $0x1a4] sm:$0xf0] }
  0xff   :  { %v3945_v57 = vpack.c.bf16 %v871_v42, %v869_v40  ;;  %v849_v51 = vmax.f32 %v841_v43, 0.0  ;;  %v2668_v40 = vld [vmem:[%s4140_s3 + $0x194] sm:$0xf]  ;;  %v2350_v42 = vld [vmem:[%s4140_s3 + $0x1a8] sm:$0xf0] }
 0x100   :  { %v814_v25 = vpop.f32.mrf.mxu2  ;;  %v2348_v43 = vld [vmem:[%s4140_s3 + $0x190] sm:$0xf] }
 0x101   :  { %v815_v52 = vadd.f32 %v814_v25, %v796_v45  ;;  %1497 = vmatmul.bf16.vlgmr.msrb.gmra.mxu1 %v3945_v57  ;;  %1535 = vmatmul.bf16.vlgmr.msrb.gmra.mxu3 %v3945_v57  ;;  %v833_v0 = vpop.f32.mrf.mxu3  ;;  %v857_v6 = vmin.f32 %v849_v51, 6.0  ;;  %v2353_v45 = vor.u32 %v2668_v40, %v2350_v42  ;;  %v2349_v46 = vor.u32 %v2671_v47, %v2348_v43 }
 0x102   :  { %1679 = vmatpush.bf16.msrb.mxu3 %v2521_v49  ;;  %1641 = vmatpush.bf16.msrb.mxu1 %v2517_v55 }
 0x103   :  { %v834_v4 = vadd.f32 %v833_v0, %v815_v52  ;;  %v865_v9 = vmul.f32 %v857_v6, %v832_v35  ;;  %v2372_v35 = vld [vmem:[%s4140_s3 + $0x1c0] sm:$0xf] }
 0x104   :  { %v2373_v61 = vor.u32 %v2677_v36, %v2372_v35 }
 0x105   :  { %v843_v53 = vadd.f32 3.0, %v834_v4  ;;  %v873_v18 = vmul.f32 0.16666667, %v865_v9 }
 0x106   :  { %1680 = vmatpush.bf16.msrb.mxu3 %v2497_v62  ;;  %1642 = vmatpush.bf16.msrb.mxu1 %v2493_v14 }
 0x107   :  { %v851_v22 = vmax.f32 %v843_v53, 0.0 }
 0x109   :  { %v859_v10 = vmin.f32 %v851_v22, 6.0  ;;  %1559 = vmatmul.bf16.gmra.mxu0 %v3817_v48  ;;  %1597 = vmatmul.bf16.gmra.mxu2 %v3817_v48 }
 0x10a   :  { %1681 = vmatpush.bf16.msrb.mxu3 %v2473_v37  ;;  %1643 = vmatpush.bf16.msrb.mxu1 %v2469_v8 }
 0x10b   :  { %v867_v12 = vmul.f32 %v859_v10, %v834_v4 }
 0x10d   :  { %v875_v21 = vmul.f32 0.16666667, %v867_v12 }
 0x10e   :  { %1682 = vmatpush.bf16.msrb.mxu3 %v2449_v13  ;;  %1644 = vmatpush.bf16.msrb.mxu1 %v2445_v17 }
 0x10f   :  { %v879_v16 = vpack.c.bf16 %v875_v21, %v873_v18 }
 0x111   :  { %1502 = vmatmul.bf16.gmra.mxu1 %v879_v16  ;;  %1540 = vmatmul.bf16.gmra.mxu3 %v879_v16 }
 0x112   :  { %1683 = vmatpush.bf16.msrb.mxu3 %v2425_v19  ;;  %1645 = vmatpush.bf16.msrb.mxu1 %v2421_v20 }
 0x116   :  { %1684 = vmatpush.bf16.msrb.mxu3 %v2401_v33  ;;  %1646 = vmatpush.bf16.msrb.mxu1 %v2397_v30 }
 0x119   :  { %1630 = vmatmul.bf16.vlgmr.msrb.gmra.mxu0 %v3703_v60  ;;  %1668 = vmatmul.bf16.vlgmr.msrb.gmra.mxu2 %v3703_v60 }
 0x11a   :  { %1685 = vmatpush.bf16.msrb.mxu3 %v2377_v59  ;;  %1647 = vmatpush.bf16.msrb.mxu1 %v2373_v61 }
 0x11e   :  { %1686 = vmatpush.bf16.msrb.mxu3 %v2353_v45  ;;  %1648 = vmatpush.bf16.msrb.mxu1 %v2349_v46 }
 0x121   :  { %1573 = vmatmul.bf16.vlgmr.msra.gmra.mxu1 %v3945_v57  ;;  %1611 = vmatmul.bf16.vlgmr.msra.gmra.mxu3 %v3945_v57 }
 0x129   :  { %1635 = vmatmul.bf16.gmra.mxu0 %v3817_v48  ;;  %1673 = vmatmul.bf16.gmra.mxu2 %v3817_v48  ;;  %v978_v48 = vperm.slane %v4058_v38, 0 }
 0x131   :  { %1578 = vmatmul.bf16.gmra.mxu1 %v879_v16  ;;  %1616 = vmatmul.bf16.gmra.mxu3 %v879_v16 }
 0x141   :  { %1649 = vmatmul.bf16.vlgmr.msrb.gmra.mxu1 %v3945_v57  ;;  %1687 = vmatmul.bf16.vlgmr.msrb.gmra.mxu3 %v3945_v57 }
 0x151   :  { %1654 = vmatmul.bf16.gmra.mxu1 %v879_v16  ;;  %1692 = vmatmul.bf16.gmra.mxu3 %v879_v16 }
 0x156   :  { %v1479_v60 = vpop.f32.mrf.mxu0 }
 0x157   :  { %v1480_v51 = vadd.f32 %v1479_v60, %v978_v48 }
 0x15c   :  { %v1517_v23 = vpop.f32.mrf.mxu2 }
 0x15d   :  { %v1518_v62 = vadd.f32 %v1517_v23, %v979_v56 }
 0x15e   :  { %v1481_v25 = vpop.f32.mrf.mxu0 }
 0x15f   :  { %v1482_v3 = vadd.f32 %v1481_v25, %v978_v48 }
 0x164   :  { %v1519_v49 = vpop.f32.mrf.mxu2 }
 0x165   :  { %v1520_v6 = vadd.f32 %v1519_v49, %v979_v56 }
 0x166   :  { %v1484_v50 = vpop.f32.mrf.mxu0 }
 0x167   :  { %v1485_v37 = vadd.f32 %v1484_v50, %v978_v48 }
 0x16c   :  { %v1522_v52 = vpop.f32.mrf.mxu2 }
 0x16d   :  { %v1523_v12 = vadd.f32 %v1522_v52, %v979_v56 }
 0x16e   :  { %v1486_v0 = vpop.f32.mrf.mxu0 }
 0x16f   :  { %v1487_v7 = vadd.f32 %v1486_v0, %v978_v48 }
 0x174   :  { %v1524_v5 = vpop.f32.mrf.mxu2 }
 0x175   :  { %v1525_v19 = vadd.f32 %v1524_v5, %v979_v56 }
 0x176   :  { %v1555_v53 = vpop.f32.mrf.mxu0 }
 0x177   :  { %v1556_v24 = vadd.f32 %v1555_v53, %v980_v44 }
 0x17c   :  { %v1593_v29 = vpop.f32.mrf.mxu2 }
 0x17d   :  { %v1594_v35 = vadd.f32 %v1593_v29, %v981_v32 }
 0x17e   :  { %v1498_v55 = vpop.f32.mrf.mxu1  ;;  %v1557_v18 = vpop.f32.mrf.mxu0 }
 0x17f   :  { %v1499_v57 = vadd.f32 %v1498_v55, %v1480_v51  ;;  %v1558_v59 = vadd.f32 %v1557_v18, %v980_v44 }
 0x181   :  { %v1698_v63 = vmax.f32 %v1499_v57, 0.0 }
 0x183   :  { %1722 = vst [vmem:[%s4143_s5] sm:$0xff] %v1698_v63 }
 0x184   :  { %v1536_v2 = vpop.f32.mrf.mxu3  ;;  %v1595_v28 = vpop.f32.mrf.mxu2 }
 0x185   :  { %v1537_v4 = vadd.f32 %v1536_v2, %v1518_v62  ;;  %v1596_v60 = vadd.f32 %v1595_v28, %v981_v32 }
 0x186   :  { %v1500_v14 = vpop.f32.mrf.mxu1  ;;  %v1560_v27 = vpop.f32.mrf.mxu0 }
 0x187   :  { %v1699_v15 = vmax.f32 %v1537_v4, 0.0  ;;  %v1501_v1 = vadd.f32 %v1500_v14, %v1482_v3  ;;  %v1561_v25 = vadd.f32 %v1560_v27, %v980_v44  ;;  %v982_v14 = vperm.slane %v4058_v38, 4 }
 0x189   :  { %1723 = vst [vmem:[%s4143_s5 + $0x8] sm:$0xff] %v1699_v15  ;;  %v1704_v39 = vmax.f32 %v1501_v1, 0.0 }
 0x18b   :  { %1728 = vst [vmem:[%s4143_s5 + $0x30] sm:$0xff] %v1704_v39 }
 0x18c   :  { %v1538_v22 = vpop.f32.mrf.mxu3  ;;  %v1598_v40 = vpop.f32.mrf.mxu2 }
 0x18d   :  { %v1539_v8 = vadd.f32 %v1538_v22, %v1520_v6  ;;  %v1599_v56 = vadd.f32 %v1598_v40, %v981_v32 }
 0x18e   :  { %v1503_v9 = vpop.f32.mrf.mxu1  ;;  %v1562_v46 = vpop.f32.mrf.mxu0 }
 0x18f   :  { %v1705_v10 = vmax.f32 %v1539_v8, 0.0  ;;  %v1504_v11 = vadd.f32 %v1503_v9, %v1485_v37  ;;  %v1563_v0 = vadd.f32 %v1562_v46, %v980_v44  ;;  %v983_v8 = vperm.slane %v4058_v38, 5 }
 0x191   :  { %1729 = vst [vmem:[%s4143_s5 + $0x38] sm:$0xff] %v1705_v10  ;;  %v1710_v58 = vmax.f32 %v1504_v11, 0.0 }
 0x193   :  { %1734 = vst [vmem:[%s4143_s5 + $0x60] sm:$0xff] %v1710_v58 }
 0x194   :  { %v1541_v13 = vpop.f32.mrf.mxu3  ;;  %v1600_v52 = vpop.f32.mrf.mxu2 }
 0x195   :  { %v1542_v17 = vadd.f32 %v1541_v13, %v1523_v12  ;;  %v1601_v5 = vadd.f32 %v1600_v52, %v981_v32 }
 0x196   :  { %v1505_v21 = vpop.f32.mrf.mxu1  ;;  %v1631_v57 = vpop.f32.mrf.mxu0 }
 0x197   :  { %v1711_v16 = vmax.f32 %v1542_v17, 0.0  ;;  %v1506_v26 = vadd.f32 %v1505_v21, %v1487_v7  ;;  %v1632_v6 = vadd.f32 %v1631_v57, %v982_v14 }
 0x199   :  { %1735 = vst [vmem:[%s4143_s5 + $0x68] sm:$0xff] %v1711_v16  ;;  %v1716_v41 = vmax.f32 %v1506_v26, 0.0 }
 0x19b   :  { %1740 = vst [vmem:[%s4143_s5 + $0x90] sm:$0xff] %v1716_v41 }
 0x19c   :  { %v1543_v20 = vpop.f32.mrf.mxu3  ;;  %v1669_v1 = vpop.f32.mrf.mxu2 }
 0x19d   :  { %v1544_v54 = vadd.f32 %v1543_v20, %v1525_v19  ;;  %v1670_v58 = vadd.f32 %v1669_v1, %v983_v8 }
 0x19e   :  { %v1574_v31 = vpop.f32.mrf.mxu1  ;;  %v1633_v22 = vpop.f32.mrf.mxu0 }
 0x19f   :  { %v1717_v33 = vmax.f32 %v1544_v54, 0.0  ;;  %v1575_v30 = vadd.f32 %v1574_v31, %v1556_v24  ;;  %v1634_v13 = vadd.f32 %v1633_v22, %v982_v14 }
 0x1a1   :  { %1741 = vst [vmem:[%s4143_s5 + $0x98] sm:$0xff] %v1717_v33  ;;  %v1700_v34 = vmax.f32 %v1575_v30, 0.0 }
 0x1a3   :  { %1724 = vst [vmem:[%s4143_s5 + $0x10] sm:$0xff] %v1700_v34 }
 0x1a4   :  { %v1612_v36 = vpop.f32.mrf.mxu3  ;;  %v1671_v29 = vpop.f32.mrf.mxu2 }
 0x1a5   :  { %v1613_v61 = vadd.f32 %v1612_v36, %v1594_v35  ;;  %v1672_v26 = vadd.f32 %v1671_v29, %v983_v8 }
 0x1a6   :  { %v1576_v42 = vpop.f32.mrf.mxu1  ;;  %v1636_v38 = vpop.f32.mrf.mxu0 }
 0x1a7   :  { %v1701_v43 = vmax.f32 %v1613_v61, 0.0  ;;  %v1577_v47 = vadd.f32 %v1576_v42, %v1558_v59  ;;  %v1637_v41 = vadd.f32 %v1636_v38, %v982_v14 }
 0x1a9   :  { %1725 = vst [vmem:[%s4143_s5 + $0x18] sm:$0xff] %v1701_v43  ;;  %v1706_v45 = vmax.f32 %v1577_v47, 0.0 }
 0x1ab   :  { %1730 = vst [vmem:[%s4143_s5 + $0x40] sm:$0xff] %v1706_v45 }
 0x1ac   :  { %v1614_v23 = vpop.f32.mrf.mxu3  ;;  %v1674_v28 = vpop.f32.mrf.mxu2 }
 0x1ad   :  { %v1615_v49 = vadd.f32 %v1614_v23, %v1596_v60  ;;  %v1675_v33 = vadd.f32 %v1674_v28, %v983_v8 }
 0x1ae   :  { %v1579_v50 = vpop.f32.mrf.mxu1  ;;  %v1638_v32 = vpop.f32.mrf.mxu0 }
 0x1af   :  { %v1707_v48 = vmax.f32 %v1615_v49, 0.0  ;;  %v1580_v51 = vadd.f32 %v1579_v50, %v1561_v25  ;;  %v1639_v27 = vadd.f32 %v1638_v32, %v982_v14 }
 0x1b1   :  { %1731 = vst [vmem:[%s4143_s5 + $0x48] sm:$0xff] %v1707_v48  ;;  %v1712_v55 = vmax.f32 %v1580_v51, 0.0 }
 0x1b3   :  { %1736 = vst [vmem:[%s4143_s5 + $0x70] sm:$0xff] %v1712_v55 }
 0x1b4   :  { %v1617_v63 = vpop.f32.mrf.mxu3  ;;  %v1676_v61 = vpop.f32.mrf.mxu2 }
 0x1b5   :  { %v1618_v62 = vadd.f32 %v1617_v63, %v1599_v56  ;;  %v1677_v42 = vadd.f32 %v1676_v61, %v983_v8 }
 0x1b6   :  { %v1581_v2 = vpop.f32.mrf.mxu1 }
 0x1b7   :  { %v1713_v3 = vmax.f32 %v1618_v62, 0.0  ;;  %v1582_v4 = vadd.f32 %v1581_v2, %v1563_v0 }
 0x1b9   :  { %1737 = vst [vmem:[%s4143_s5 + $0x78] sm:$0xff] %v1713_v3  ;;  %v1718_v15 = vmax.f32 %v1582_v4, 0.0 }
 0x1bb   :  { %1742 = vst [vmem:[%s4143_s5 + $0xa0] sm:$0xff] %v1718_v15 }
 0x1bc   :  { %v1619_v39 = vpop.f32.mrf.mxu3 }
 0x1bd   :  { %v1620_v53 = vadd.f32 %v1619_v39, %v1601_v5 }
 0x1be   :  { %v1650_v37 = vpop.f32.mrf.mxu1 }
 0x1bf   :  { %v1719_v9 = vmax.f32 %v1620_v53, 0.0  ;;  %v1651_v10 = vadd.f32 %v1650_v37, %v1632_v6 }
 0x1c1   :  { %1743 = vst [vmem:[%s4143_s5 + $0xa8] sm:$0xff] %v1719_v9  ;;  %v1702_v11 = vmax.f32 %v1651_v10, 0.0 }
 0x1c3   :  { %1726 = vst [vmem:[%s4143_s5 + $0x20] sm:$0xff] %v1702_v11 }
 0x1c4   :  { %v1688_v12 = vpop.f32.mrf.mxu3 }
 0x1c5   :  { %v1689_v7 = vadd.f32 %v1688_v12, %v1670_v58 }
 0x1c6   :  { %v1652_v17 = vpop.f32.mrf.mxu1 }
 0x1c7   :  { %v1703_v18 = vmax.f32 %v1689_v7, 0.0  ;;  %v1653_v21 = vadd.f32 %v1652_v17, %v1634_v13 }
 0x1c9   :  { %1727 = vst [vmem:[%s4143_s5 + $0x28] sm:$0xff] %v1703_v18  ;;  %v1708_v16 = vmax.f32 %v1653_v21, 0.0 }
 0x1cb   :  { %1732 = vst [vmem:[%s4143_s5 + $0x50] sm:$0xff] %v1708_v16 }
 0x1cc   :  { %v1690_v44 = vpop.f32.mrf.mxu3 }
 0x1cd   :  { %v1691_v19 = vadd.f32 %v1690_v44, %v1672_v26 }
 0x1ce   :  { %v1655_v20 = vpop.f32.mrf.mxu1 }
 0x1cf   :  { %v1709_v24 = vmax.f32 %v1691_v19, 0.0  ;;  %v1656_v54 = vadd.f32 %v1655_v20, %v1637_v41 }
 0x1d1   :  { %1733 = vst [vmem:[%s4143_s5 + $0x58] sm:$0xff] %v1709_v24  ;;  %v1714_v31 = vmax.f32 %v1656_v54, 0.0 }
 0x1d3   :  { %1738 = vst [vmem:[%s4143_s5 + $0x80] sm:$0xff] %v1714_v31 }
 0x1d4   :  { %v1693_v30 = vpop.f32.mrf.mxu3 }
 0x1d5   :  { %v1694_v34 = vadd.f32 %v1693_v30, %v1675_v33 }
 0x1d6   :  { %v1657_v35 = vpop.f32.mrf.mxu1 }
 0x1d7   :  { %v1715_v36 = vmax.f32 %v1694_v34, 0.0  ;;  %v1658_v59 = vadd.f32 %v1657_v35, %v1639_v27 }
 0x1d9   :  { %1739 = vst [vmem:[%s4143_s5 + $0x88] sm:$0xff] %v1715_v36  ;;  %v1720_v40 = vmax.f32 %v1658_v59, 0.0 }
 0x1db   :  { %1744 = vst [vmem:[%s4143_s5 + $0xb0] sm:$0xff] %v1720_v40 }
 0x1dc   :  { %v1695_v43 = vpop.f32.mrf.mxu3 }
 0x1dd   :  { %v1696_v47 = vadd.f32 %v1695_v43, %v1677_v42 }
 0x1df   :  { %v1721_v45 = vmax.f32 %v1696_v47, 0.0 }
 0x1e1   :  { %1745 = vst [vmem:[%s4143_s5 + $0xb8] sm:$0xff] %v1721_v45 }

</bundles_post_ra>
